<compile_context>
chip_gen: v7x
topology: tpu7x:2x2x1
jax: 0.10.0
libtpu: 0.0.40
codegen_flags: <defaults>
</compile_context>

<pallas_src>
from functools import partial

import jax
import jax.numpy as jnp
from jax import lax
from jax.experimental import pallas as pl
from jax.experimental.pallas import tpu as pltpu

EPS = 1e-5  # nn.BatchNorm2d default eps


def _vmem_limit_bytes():
    """Generation-aware VMEM limit: ~75% of physical, capped at 100 MiB."""
    limit = 48 * 1024 * 1024
    try:
        cap = int(pltpu.get_tpu_info().vmem_capacity_bytes)
        limit = min(cap * 3 // 4, 100 * 1024 * 1024)
    except Exception:
        pass
    return int(limit)


# --------------------------------------------------------------------------
# K1: ConvTranspose2d(k=2, s=2) as one (4*Cup, Cin) x (Cin, H*W) matmul per
#     image.  Result rows are ordered (cout, di, dj); the 2x2 spatial
#     interleave is layout plumbing done once in the wrapper.
# --------------------------------------------------------------------------
def upconv_kernel(x_ref, w_ref, b_ref, o_ref):
    o_ref[0] = jnp.dot(w_ref[...], x_ref[0],
                       preferred_element_type=jnp.float32) + b_ref[...]


# --------------------------------------------------------------------------
# Shared im2col helper: taps are contiguous lane slices of the flat scratch
# (same-stride trick), masked on the left/right image columns.
# --------------------------------------------------------------------------
def _conv3x3_from_flat_scratch(xs, ml, mr, w, W2, P):
    def tap(ky, kx):
        t = xs[:, ky * W2 + kx: ky * W2 + kx + P]
        if kx == 0:
            t = t * ml
        if kx == 2:
            t = t * mr
        return t

    patches = jnp.concatenate(
        [tap(ky, kx) for ky in range(3) for kx in range(3)], axis=0)
    return jnp.dot(w, patches, preferred_element_type=jnp.float32)   # (C, P)


# --------------------------------------------------------------------------
# K2: fused concat(up, skip) + zero-pad + conv1 (one im2col matmul) + per-image
#     BN partial statistics.  Conv bias omitted (absorbed by training-mode BN).
# --------------------------------------------------------------------------
def fused_concat_conv1_kernel(up_ref, skip_ref, ml_ref, mr_ref, w_ref,
                              raw_ref, stats_ref, xs, *, W2):
    _, Cup, P = up_ref.shape
    C1in, L = xs.shape

    # zero halo rows (top row + shift / bottom row + guard).  The data region
    # is fully overwritten every grid step, so this is megacore-safe.
    xs[:, 0:W2 + 1] = jnp.zeros((C1in, W2 + 1), jnp.float32)
    xs[:, W2 + 1 + P:L] = jnp.zeros((C1in, W2 + 1), jnp.float32)

    # fused torch.cat([up, skip], dim=1): two contiguous lane-dense stores
    xs[0:Cup, W2 + 1:W2 + 1 + P] = up_ref[0]
    xs[Cup:C1in, W2 + 1:W2 + 1 + P] = skip_ref[0]

    acc = _conv3x3_from_flat_scratch(xs, ml_ref[...], mr_ref[...],
                                     w_ref[...], W2, P)               # (C, P)
    raw_ref[0] = acc
    stats_ref[0] = jnp.concatenate(
        [jnp.sum(acc, axis=1, keepdims=True),
         jnp.sum(acc * acc, axis=1, keepdims=True)], axis=1)          # (C, 2)


# --------------------------------------------------------------------------
# K3: fused BN1(folded scale/shift) + ReLU -> conv2 (im2col matmul) + stats.
# --------------------------------------------------------------------------
def bn_relu_conv2_kernel(raw_ref, sc_ref, sh_ref, ml_ref, mr_ref, w_ref,
                         raw2_ref, stats_ref, xs, *, W2):
    _, C, P = raw_ref.shape
    L = xs.shape[1]

    y = jnp.maximum(raw_ref[0] * sc_ref[...] + sh_ref[...], 0.0)      # (C, P)

    xs[:, 0:W2 + 1] = jnp.zeros((C, W2 + 1), jnp.float32)
    xs[:, W2 + 1 + P:L] = jnp.zeros((C, W2 + 1), jnp.float32)
    xs[:, W2 + 1:W2 + 1 + P] = y

    acc = _conv3x3_from_flat_scratch(xs, ml_ref[...], mr_ref[...],
                                     w_ref[...], W2, P)
    raw2_ref[0] = acc
    stats_ref[0] = jnp.concatenate(
        [jnp.sum(acc, axis=1, keepdims=True),
         jnp.sum(acc * acc, axis=1, keepdims=True)], axis=1)


# --------------------------------------------------------------------------
# K4: fused BN2 + ReLU (lane-dense (C, H2*W2) -> already NCHW order).
# --------------------------------------------------------------------------
def bn_relu_kernel(x_ref, sc_ref, sh_ref, o_ref):
    o_ref[0] = jnp.maximum(x_ref[0] * sc_ref[...] + sh_ref[...], 0.0)


def _bn_fold(stats, gamma, beta, count):
    """Reduce per-image (sum, sumsq) partials -> folded BN scale/shift (C,1)."""
    tot = jnp.sum(stats, axis=0)                      # (C, 2)
    mean = tot[:, 0] / count
    var = tot[:, 1] / count - mean * mean             # biased var (training BN)
    scale = gamma * lax.rsqrt(var + EPS)
    shift = beta - mean * scale
    c = mean.shape[0]
    return scale.reshape(c, 1), shift.reshape(c, 1)


def decoder_block_forward(x_nchw, skip_nchw, params):
    """decoder_block forward.  x: (N, in_c, H, W), skip: (N, out_c, 2H, 2W)."""
    wu, bu, w1, b1, g1, bt1, w2, b2, g2, bt2 = params
    del b1, b2  # conv biases in front of training-mode BN are exact no-ops

    N, Cin, H, W = x_nchw.shape
    Cup = wu.shape[1]                 # ConvTranspose2d weight: (in_c, out_c, 2, 2)
    H2, W2 = 2 * H, 2 * W
    P = H2 * W2
    C1in = 2 * Cup                    # channels of concat(up, skip)
    C = w1.shape[0]                   # out_c
    L = P + 2 * W2 + 2                # flat padded-scratch length (same-stride trick)

    par = pltpu.CompilerParams(dimension_semantics=("parallel",),
                               vmem_limit_bytes=_vmem_limit_bytes())

    # channel-first flat-spatial views (pure reshapes, zero HBM traffic)
    x_flat = x_nchw.reshape(N, Cin, H * W)
    skip_flat = skip_nchw.reshape(N, Cup, P)

    # lane masks handling the left/right image-column zero padding
    col = jnp.arange(P, dtype=jnp.int32) % W2
    mask_l = (col != 0).astype(jnp.float32).reshape(1, P)
    mask_r = (col != W2 - 1).astype(jnp.float32).reshape(1, P)

    # ---- K1: transposed conv as one matmul per image -------------------------
    wu_mat = jnp.transpose(wu, (1, 2, 3, 0)).reshape(4 * Cup, Cin)  # rows (co,di,dj)
    bu_col = jnp.repeat(bu, 4).reshape(4 * Cup, 1)

    up_rows = pl.pallas_call(
        upconv_kernel,
        grid=(N,),
        in_specs=[pl.BlockSpec((1, Cin, H * W), lambda n: (n, 0, 0)),
                  pl.BlockSpec((4 * Cup, Cin), lambda n: (0, 0)),
                  pl.BlockSpec((4 * Cup, 1), lambda n: (0, 0))],
        out_specs=pl.BlockSpec((1, 4 * Cup, H * W), lambda n: (n, 0, 0)),
        out_shape=jax.ShapeDtypeStruct((N, 4 * Cup, H * W), jnp.float32),
        compiler_params=par,
    )(x_flat, wu_mat, bu_col)

    # 2x2 sub-pixel interleave: (n, co, di, dj, i, j) -> (n, co, 2i+di, 2j+dj)
    # (single XLA pass over the Cup-channel tensor; remaining layout plumbing)
    up = up_rows.reshape(N, Cup, 2, 2, H, W).transpose(0, 1, 4, 2, 5, 3)
    up_flat = up.reshape(N, Cup, P)

    # ---- K2: concat + pad + conv1 + per-image BN partial stats ---------------
    w1_mat = jnp.transpose(w1, (0, 2, 3, 1)).reshape(C, 9 * C1in)   # cols (ky,kx,ci)
    raw1, stats1 = pl.pallas_call(
        partial(fused_concat_conv1_kernel, W2=W2),
        grid=(N,),
        in_specs=[pl.BlockSpec((1, Cup, P), lambda n: (n, 0, 0)),
                  pl.BlockSpec((1, Cup, P), lambda n: (n, 0, 0)),
                  pl.BlockSpec((1, P), lambda n: (0, 0)),
                  pl.BlockSpec((1, P), lambda n: (0, 0)),
                  pl.BlockSpec((C, 9 * C1in), lambda n: (0, 0))],
        out_specs=(pl.BlockSpec((1, C, P), lambda n: (n, 0, 0)),
                   pl.BlockSpec((1, C, 2), lambda n: (n, 0, 0))),
        out_shape=(jax.ShapeDtypeStruct((N, C, P), jnp.float32),
                   jax.ShapeDtypeStruct((N, C, 2), jnp.float32)),
        scratch_shapes=[pltpu.VMEM((C1in, L), jnp.float32)],
        compiler_params=par,
    )(up_flat, skip_flat, mask_l, mask_r, w1_mat)

    scale1, shift1 = _bn_fold(stats1, g1, bt1, N * P)

    # ---- K3: BN1 + ReLU -> conv2 + per-image BN partial stats -----------------
    w2_mat = jnp.transpose(w2, (0, 2, 3, 1)).reshape(C, 9 * C)
    raw2, stats2 = pl.pallas_call(
        partial(bn_relu_conv2_kernel, W2=W2),
        grid=(N,),
        in_specs=[pl.BlockSpec((1, C, P), lambda n: (n, 0, 0)),
                  pl.BlockSpec((C, 1), lambda n: (0, 0)),
                  pl.BlockSpec((C, 1), lambda n: (0, 0)),
                  pl.BlockSpec((1, P), lambda n: (0, 0)),
                  pl.BlockSpec((1, P), lambda n: (0, 0)),
                  pl.BlockSpec((C, 9 * C), lambda n: (0, 0))],
        out_specs=(pl.BlockSpec((1, C, P), lambda n: (n, 0, 0)),
                   pl.BlockSpec((1, C, 2), lambda n: (n, 0, 0))),
        out_shape=(jax.ShapeDtypeStruct((N, C, P), jnp.float32),
                   jax.ShapeDtypeStruct((N, C, 2), jnp.float32)),
        scratch_shapes=[pltpu.VMEM((C, L), jnp.float32)],
        compiler_params=par,
    )(raw1, scale1, shift1, mask_l, mask_r, w2_mat)

    scale2, shift2 = _bn_fold(stats2, g2, bt2, N * P)

    # ---- K4: BN2 + ReLU (output already in NCHW element order) ---------------
    out_flat = pl.pallas_call(
        bn_relu_kernel,
        grid=(N,),
        in_specs=[pl.BlockSpec((1, C, P), lambda n: (n, 0, 0)),
                  pl.BlockSpec((C, 1), lambda n: (0, 0)),
                  pl.BlockSpec((C, 1), lambda n: (0, 0))],
        out_specs=pl.BlockSpec((1, C, P), lambda n: (n, 0, 0)),
        out_shape=jax.ShapeDtypeStruct((N, C, P), jnp.float32),
        compiler_params=par,
    )(raw2, scale2, shift2)

    return out_flat.reshape(N, C, H2, W2)          # free reshape, no transpose


# --------------------------------------------------------------------------
# Pure-JAX reference (matches PyTorch training-mode forward, biases included)
# --------------------------------------------------------------------------
def decoder_block_ref(x, skip, params):
    wu, bu, w1, b1, g1, bt1, w2, b2, g2, bt2 = params
    N, _, H, W = x.shape
    Cup = wu.shape[1]

    # ConvTranspose2d(k=2, s=2, pad=0)
    t = jnp.einsum('ncij,cokl->noikjl', x, wu)
    up = t.reshape(N, Cup, 2 * H, 2 * W) + bu[None, :, None, None]
    xin = jnp.concatenate([up, skip], axis=1)

    def conv(z, w, b):
        y = lax.conv_general_dilated(z, w, (1, 1), ((1, 1), (1, 1)),
                                     dimension_numbers=('NCHW', 'OIHW', 'NCHW'))
        return y + b[None, :, None, None]

    def bn_relu(y, g, bt):
        m = jnp.mean(y, axis=(0, 2, 3), keepdims=True)
        v = jnp.mean((y - m) ** 2, axis=(0, 2, 3), keepdims=True)
        yn = (y - m) * lax.rsqrt(v + EPS)
        return jnp.maximum(yn * g[None, :, None, None] + bt[None, :, None, None], 0.0)

    h = bn_relu(conv(xin, w1, b1), g1, bt1)
    return bn_relu(conv(h, w2, b2), g2, bt2)


if __name__ == "__main__":
    key = jax.random.PRNGKey(0)
    N, in_c, out_c, H, W = 2, 32, 16, 8, 8
    ks = jax.random.split(key, 12)

    x    = jax.random.normal(ks[0], (N, in_c, H, W), jnp.float32)
    skip = jax.random.normal(ks[1], (N, out_c, 2 * H, 2 * W), jnp.float32)

    wu = 0.1 * jax.random.normal(ks[2], (in_c, out_c, 2, 2), jnp.float32)
    bu = 0.1 * jax.random.normal(ks[3], (out_c,), jnp.float32)
    w1 = 0.1 * jax.random.normal(ks[4], (out_c, 2 * out_c, 3, 3), jnp.float32)
    b1 = 0.1 * jax.random.normal(ks[5], (out_c,), jnp.float32)
    w2 = 0.1 * jax.random.normal(ks[6], (out_c, out_c, 3, 3), jnp.float32)
    b2 = 0.1 * jax.random.normal(ks[7], (out_c,), jnp.float32)
    g1  = 1.0 + 0.1 * jax.random.normal(ks[8], (out_c,), jnp.float32)
    bt1 = 0.1 * jax.random.normal(ks[9], (out_c,), jnp.float32)
    g2  = 1.0 + 0.1 * jax.random.normal(ks[10], (out_c,), jnp.float32)
    bt2 = 0.1 * jax.random.normal(ks[11], (out_c,), jnp.float32)
    params = (wu, bu, w1, b1, g1, bt1, w2, b2, g2, bt2)

    out = jax.jit(decoder_block_forward)(x, skip, params)
    out = jax.block_until_ready(out)

    ref = decoder_block_ref(x, skip, params)
    assert out.shape == (N, out_c, 2 * H, 2 * W)
    err = jnp.max(jnp.abs(out - ref))
    assert jnp.allclose(out, ref, atol=5e-4, rtol=5e-4), f"max abs err {err}"

    print("KERNEL_OK")
</pallas_src>

<mosaic_0001>
module attributes {stable_mosaic.version = 11 : i64} {
  func.func @upconv_kernel(%arg0: i32, %arg1: memref<1x32x64xf32, #tpu.memory_space<vmem>>, %arg2: memref<64x32xf32, #tpu.memory_space<vmem>>, %arg3: memref<64x1xf32, #tpu.memory_space<vmem>>, %arg4: memref<1x64x64xf32, #tpu.memory_space<vmem>>) attributes {dimension_semantics = [#tpu.dimension_semantics<parallel>], iteration_bounds = array<i64: 2>, scalar_prefetch = 0 : i64, scratch_operands = 0 : i64, tpu.core_type = #tpu.core_type<tc>, window_params = [{transform_indices = @transform_0, window_bounds = array<i64: 1, 32, 64>}, {pipeline_mode = #tpu.pipeline_mode<synchronous>, transform_indices = @transform_1, window_bounds = array<i64: 64, 32>}, {pipeline_mode = #tpu.pipeline_mode<synchronous>, transform_indices = @transform_2, window_bounds = array<i64: 64, 1>}, {transform_indices = @transform_3, window_bounds = array<i64: 1, 64, 64>}]} {
    %c0 = arith.constant 0 : index
    %c0_0 = arith.constant 0 : index
    %0 = vector.load %arg2[%c0, %c0_0] : memref<64x32xf32, #tpu.memory_space<vmem>>, vector<64x32xf32>
    %c0_1 = arith.constant 0 : index
    %c0_2 = arith.constant 0 : index
    %c0_3 = arith.constant 0 : index
    %1 = vector.load %arg1[%c0_1, %c0_2, %c0_3] : memref<1x32x64xf32, #tpu.memory_space<vmem>>, vector<1x32x64xf32>
    %2 = vector.shape_cast %1 : vector<1x32x64xf32> to vector<32x64xf32>
    %cst = arith.constant dense<0.000000e+00> : vector<64x64xf32>
    %3 = tpu.matmul %0, %2, %cst {dimension_numbers = #tpu.dot_dimension_numbers<[1], [0], [0], [1], [0, 0, 1, 1], [], []>} : vector<64x32xf32>, vector<32x64xf32>, vector<64x64xf32> -> vector<64x64xf32>
    %c0_4 = arith.constant 0 : index
    %c0_5 = arith.constant 0 : index
    %4 = vector.load %arg3[%c0_4, %c0_5] : memref<64x1xf32, #tpu.memory_space<vmem>>, vector<64x1xf32>
    %5 = vector.broadcast %4 : vector<64x1xf32> to vector<64x64xf32>
    %6 = arith.addf %3, %5 : vector<64x64xf32>
    %c0_6 = arith.constant 0 : index
    %c0_7 = arith.constant 0 : index
    %c0_8 = arith.constant 0 : index
    %7 = vector.load %arg4[%c0_6, %c0_7, %c0_8] : memref<1x64x64xf32, #tpu.memory_space<vmem>>, vector<1x64x64xf32>
    %8 = vector.shape_cast %7 : vector<1x64x64xf32> to vector<64x64xf32>
    %9 = vector.shape_cast %6 : vector<64x64xf32> to vector<1x64x64xf32>
    tpu.vector_store %arg4[%c0_6, %c0_7, %c0_8], %9 {strides = array<i32>} : memref<1x64x64xf32, #tpu.memory_space<vmem>>, vector<1x64x64xf32>,
    return
  }
  func.func @transform_0(%arg0: i32) -> (i32, i32, i32) {
    %c0_i32 = arith.constant 0 : i32
    %c0_i32_0 = arith.constant 0 : i32
    %c0_i32_1 = arith.constant 0 : i32
    return %arg0, %c0_i32, %c0_i32_0 : i32, i32, i32
  }
  func.func @transform_1(%arg0: i32) -> (i32, i32) {
    %c0_i32 = arith.constant 0 : i32
    %c0_i32_0 = arith.constant 0 : i32
    %c0_i32_1 = arith.constant 0 : i32
    return %c0_i32, %c0_i32_0 : i32, i32
  }
  func.func @transform_2(%arg0: i32) -> (i32, i32) {
    %c0_i32 = arith.constant 0 : i32
    %c0_i32_0 = arith.constant 0 : i32
    %c0_i32_1 = arith.constant 0 : i32
    return %c0_i32, %c0_i32_0 : i32, i32
  }
  func.func @transform_3(%arg0: i32) -> (i32, i32, i32) {
    %c0_i32 = arith.constant 0 : i32
    %c0_i32_0 = arith.constant 0 : i32
    %c0_i32_1 = arith.constant 0 : i32
    return %arg0, %c0_i32, %c0_i32_0 : i32, i32, i32
  }
}

module attributes {stable_mosaic.version = 11 : i64} {
  func.func @fused_concat_conv1_kernel(%arg0: i32, %arg1: memref<1x16x256xf32, #tpu.memory_space<vmem>>, %arg2: memref<1x16x256xf32, #tpu.memory_space<vmem>>, %arg3: memref<1x256xf32, #tpu.memory_space<vmem>>, %arg4: memref<1x256xf32, #tpu.memory_space<vmem>>, %arg5: memref<16x288xf32, #tpu.memory_space<vmem>>, %arg6: memref<1x16x256xf32, #tpu.memory_space<vmem>>, %arg7: memref<1x16x2xf32, #tpu.memory_space<vmem>>, %arg8: memref<32x290xf32, #tpu.memory_space<vmem>>) attributes {dimension_semantics = [#tpu.dimension_semantics<parallel>], iteration_bounds = array<i64: 2>, scalar_prefetch = 0 : i64, scratch_operands = 1 : i64, tpu.core_type = #tpu.core_type<tc>, window_params = [{transform_indices = @transform_0, window_bounds = array<i64: 1, 16, 256>}, {transform_indices = @transform_1, window_bounds = array<i64: 1, 16, 256>}, {pipeline_mode = #tpu.pipeline_mode<synchronous>, transform_indices = @transform_2, window_bounds = array<i64: 1, 256>}, {pipeline_mode = #tpu.pipeline_mode<synchronous>, transform_indices = @transform_3, window_bounds = array<i64: 1, 256>}, {pipeline_mode = #tpu.pipeline_mode<synchronous>, transform_indices = @transform_4, window_bounds = array<i64: 16, 288>}, {transform_indices = @transform_5, window_bounds = array<i64: 1, 16, 256>}, {transform_indices = @transform_6, window_bounds = array<i64: 1, 16, 2>}]} {
    %cst = arith.constant 0.000000e+00 : f32
    %0 = vector.broadcast %cst : f32 to vector<32x17xf32>
    %c0 = arith.constant 0 : index
    %c0_0 = arith.constant 0 : index
    %1 = vector.load %arg8[%c0, %c0_0] : memref<32x290xf32, #tpu.memory_space<vmem>>, vector<32x17xf32>
    tpu.vector_store %arg8[%c0, %c0_0], %0 {strides = array<i32>} : memref<32x290xf32, #tpu.memory_space<vmem>>, vector<32x17xf32>,
    %cst_1 = arith.constant 0.000000e+00 : f32
    %2 = vector.broadcast %cst_1 : f32 to vector<32x17xf32>
    %c0_2 = arith.constant 0 : index
    %c273 = arith.constant 273 : index
    %3 = vector.load %arg8[%c0_2, %c273] : memref<32x290xf32, #tpu.memory_space<vmem>>, vector<32x17xf32>
    tpu.vector_store %arg8[%c0_2, %c273], %2 {strides = array<i32>} : memref<32x290xf32, #tpu.memory_space<vmem>>, vector<32x17xf32>,
    %c0_3 = arith.constant 0 : index
    %c0_4 = arith.constant 0 : index
    %c0_5 = arith.constant 0 : index
    %4 = vector.load %arg1[%c0_3, %c0_4, %c0_5] : memref<1x16x256xf32, #tpu.memory_space<vmem>>, vector<1x16x256xf32>
    %5 = vector.shape_cast %4 : vector<1x16x256xf32> to vector<16x256xf32>
    %c0_6 = arith.constant 0 : index
    %c17 = arith.constant 17 : index
    %6 = vector.load %arg8[%c0_6, %c17] : memref<32x290xf32, #tpu.memory_space<vmem>>, vector<16x256xf32>
    tpu.vector_store %arg8[%c0_6, %c17], %5 {strides = array<i32>} : memref<32x290xf32, #tpu.memory_space<vmem>>, vector<16x256xf32>,
    %c0_7 = arith.constant 0 : index
    %c0_8 = arith.constant 0 : index
    %c0_9 = arith.constant 0 : index
    %7 = vector.load %arg2[%c0_7, %c0_8, %c0_9] : memref<1x16x256xf32, #tpu.memory_space<vmem>>, vector<1x16x256xf32>
    %8 = vector.shape_cast %7 : vector<1x16x256xf32> to vector<16x256xf32>
    %c16 = arith.constant 16 : index
    %c17_10 = arith.constant 17 : index
    %9 = vector.load %arg8[%c16, %c17_10] : memref<32x290xf32, #tpu.memory_space<vmem>>, vector<16x256xf32>
    tpu.vector_store %arg8[%c16, %c17_10], %8 {strides = array<i32>} : memref<32x290xf32, #tpu.memory_space<vmem>>, vector<16x256xf32>,
    %c0_11 = arith.constant 0 : index
    %c0_12 = arith.constant 0 : index
    %10 = vector.load %arg3[%c0_11, %c0_12] : memref<1x256xf32, #tpu.memory_space<vmem>>, vector<1x256xf32>
    %c0_13 = arith.constant 0 : index
    %c0_14 = arith.constant 0 : index
    %11 = vector.load %arg4[%c0_13, %c0_14] : memref<1x256xf32, #tpu.memory_space<vmem>>, vector<1x256xf32>
    %c0_15 = arith.constant 0 : index
    %c0_16 = arith.constant 0 : index
    %12 = vector.load %arg5[%c0_15, %c0_16] : memref<16x288xf32, #tpu.memory_space<vmem>>, vector<16x288xf32>
    %c0_17 = arith.constant 0 : index
    %c0_18 = arith.constant 0 : index
    %13 = vector.load %arg8[%c0_17, %c0_18] : memref<32x290xf32, #tpu.memory_space<vmem>>, vector<32x256xf32>
    %14 = vector.broadcast %10 : vector<1x256xf32> to vector<32x256xf32>
    %15 = arith.mulf %13, %14 : vector<32x256xf32>
    %c0_19 = arith.constant 0 : index
    %c1 = arith.constant 1 : index
    %16 = vector.load %arg8[%c0_19, %c1] : memref<32x290xf32, #tpu.memory_space<vmem>>, vector<32x256xf32>
    %c0_20 = arith.constant 0 : index
    %c2 = arith.constant 2 : index
    %17 = vector.load %arg8[%c0_20, %c2] : memref<32x290xf32, #tpu.memory_space<vmem>>, vector<32x256xf32>
    %18 = vector.broadcast %11 : vector<1x256xf32> to vector<32x256xf32>
    %19 = arith.mulf %17, %18 : vector<32x256xf32>
    %c0_21 = arith.constant 0 : index
    %c16_22 = arith.constant 16 : index
    %20 = vector.load %arg8[%c0_21, %c16_22] : memref<32x290xf32, #tpu.memory_space<vmem>>, vector<32x256xf32>
    %21 = vector.broadcast %10 : vector<1x256xf32> to vector<32x256xf32>
    %22 = arith.mulf %20, %21 : vector<32x256xf32>
    %c0_23 = arith.constant 0 : index
    %c17_24 = arith.constant 17 : index
    %23 = vector.load %arg8[%c0_23, %c17_24] : memref<32x290xf32, #tpu.memory_space<vmem>>, vector<32x256xf32>
    %c0_25 = arith.constant 0 : index
    %c18 = arith.constant 18 : index
    %24 = vector.load %arg8[%c0_25, %c18] : memref<32x290xf32, #tpu.memory_space<vmem>>, vector<32x256xf32>
    %25 = vector.broadcast %11 : vector<1x256xf32> to vector<32x256xf32>
    %26 = arith.mulf %24, %25 : vector<32x256xf32>
    %c0_26 = arith.constant 0 : index
    %c32 = arith.constant 32 : index
    %27 = vector.load %arg8[%c0_26, %c32] : memref<32x290xf32, #tpu.memory_space<vmem>>, vector<32x256xf32>
    %28 = vector.broadcast %10 : vector<1x256xf32> to vector<32x256xf32>
    %29 = arith.mulf %27, %28 : vector<32x256xf32>
    %c0_27 = arith.constant 0 : index
    %c33 = arith.constant 33 : index
    %30 = vector.load %arg8[%c0_27, %c33] : memref<32x290xf32, #tpu.memory_space<vmem>>, vector<32x256xf32>
    %c0_28 = arith.constant 0 : index
    %c34 = arith.constant 34 : index
    %31 = vector.load %arg8[%c0_28, %c34] : memref<32x290xf32, #tpu.memory_space<vmem>>, vector<32x256xf32>
    %32 = vector.broadcast %11 : vector<1x256xf32> to vector<32x256xf32>
    %33 = arith.mulf %31, %32 : vector<32x256xf32>
    %34 = tpu.concatenate %15, %16, %19, %22, %23, %26, %29, %30, %33 in 0 : vector<32x256xf32>, vector<32x256xf32>, vector<32x256xf32>, vector<32x256xf32>, vector<32x256xf32>, vector<32x256xf32>, vector<32x256xf32>, vector<32x256xf32>, vector<32x256xf32> -> vector<288x256xf32>
    %cst_29 = arith.constant dense<0.000000e+00> : vector<16x256xf32>
    %35 = tpu.matmul %12, %34, %cst_29 {dimension_numbers = #tpu.dot_dimension_numbers<[1], [0], [0], [1], [0, 0, 1, 1], [], []>} : vector<16x288xf32>, vector<288x256xf32>, vector<16x256xf32> -> vector<16x256xf32>
    %c0_30 = arith.constant 0 : index
    %c0_31 = arith.constant 0 : index
    %c0_32 = arith.constant 0 : index
    %36 = vector.load %arg6[%c0_30, %c0_31, %c0_32] : memref<1x16x256xf32, #tpu.memory_space<vmem>>, vector<1x16x256xf32>
    %37 = vector.shape_cast %36 : vector<1x16x256xf32> to vector<16x256xf32>
    %38 = vector.shape_cast %35 : vector<16x256xf32> to vector<1x16x256xf32>
    tpu.vector_store %arg6[%c0_30, %c0_31, %c0_32], %38 {strides = array<i32>} : memref<1x16x256xf32, #tpu.memory_space<vmem>>, vector<1x16x256xf32>,
    %cst_33 = arith.constant dense<0.000000e+00> : vector<16xf32>
    %39 = vector.multi_reduction <add>, %35, %cst_33 [1] : vector<16x256xf32> to vector<16xf32>
    %40 = vector.shape_cast %39 : vector<16xf32> to vector<16x1xf32>
    %41 = arith.mulf %35, %35 : vector<16x256xf32>
    %cst_34 = arith.constant dense<0.000000e+00> : vector<16xf32>
    %42 = vector.multi_reduction <add>, %41, %cst_34 [1] : vector<16x256xf32> to vector<16xf32>
    %43 = vector.shape_cast %42 : vector<16xf32> to vector<16x1xf32>
    %44 = tpu.concatenate %40, %43 in 1 : vector<16x1xf32>, vector<16x1xf32> -> vector<16x2xf32>
    %c0_35 = arith.constant 0 : index
    %c0_36 = arith.constant 0 : index
    %c0_37 = arith.constant 0 : index
    %45 = vector.load %arg7[%c0_35, %c0_36, %c0_37] : memref<1x16x2xf32, #tpu.memory_space<vmem>>, vector<1x16x2xf32>
    %46 = vector.shape_cast %45 : vector<1x16x2xf32> to vector<16x2xf32>
    %47 = vector.shape_cast %44 : vector<16x2xf32> to vector<1x16x2xf32>
    tpu.vector_store %arg7[%c0_35, %c0_36, %c0_37], %47 {strides = array<i32>} : memref<1x16x2xf32, #tpu.memory_space<vmem>>, vector<1x16x2xf32>,
    return
  }
  func.func @transform_0(%arg0: i32) -> (i32, i32, i32) {
    %c0_i32 = arith.constant 0 : i32
    %c0_i32_0 = arith.constant 0 : i32
    %c0_i32_1 = arith.constant 0 : i32
    return %arg0, %c0_i32, %c0_i32_0 : i32, i32, i32
  }
  func.func @transform_1(%arg0: i32) -> (i32, i32, i32) {
    %c0_i32 = arith.constant 0 : i32
    %c0_i32_0 = arith.constant 0 : i32
    %c0_i32_1 = arith.constant 0 : i32
    return %arg0, %c0_i32, %c0_i32_0 : i32, i32, i32
  }
  func.func @transform_2(%arg0: i32) -> (i32, i32) {
    %c0_i32 = arith.constant 0 : i32
    %c0_i32_0 = arith.constant 0 : i32
    %c0_i32_1 = arith.constant 0 : i32
    return %c0_i32, %c0_i32_0 : i32, i32
  }
  func.func @transform_3(%arg0: i32) -> (i32, i32) {
    %c0_i32 = arith.constant 0 : i32
    %c0_i32_0 = arith.constant 0 : i32
    %c0_i32_1 = arith.constant 0 : i32
    return %c0_i32, %c0_i32_0 : i32, i32
  }
  func.func @transform_4(%arg0: i32) -> (i32, i32) {
    %c0_i32 = arith.constant 0 : i32
    %c0_i32_0 = arith.constant 0 : i32
    %c0_i32_1 = arith.constant 0 : i32
    return %c0_i32, %c0_i32_0 : i32, i32
  }
  func.func @transform_5(%arg0: i32) -> (i32, i32, i32) {
    %c0_i32 = arith.constant 0 : i32
    %c0_i32_0 = arith.constant 0 : i32
    %c0_i32_1 = arith.constant 0 : i32
    return %arg0, %c0_i32, %c0_i32_0 : i32, i32, i32
  }
  func.func @transform_6(%arg0: i32) -> (i32, i32, i32) {
    %c0_i32 = arith.constant 0 : i32
    %c0_i32_0 = arith.constant 0 : i32
    %c0_i32_1 = arith.constant 0 : i32
    return %arg0, %c0_i32, %c0_i32_0 : i32, i32, i32
  }
}

module attributes {stable_mosaic.version = 11 : i64} {
  func.func @bn_relu_conv2_kernel(%arg0: i32, %arg1: memref<1x16x256xf32, #tpu.memory_space<vmem>>, %arg2: memref<16x1xf32, #tpu.memory_space<vmem>>, %arg3: memref<16x1xf32, #tpu.memory_space<vmem>>, %arg4: memref<1x256xf32, #tpu.memory_space<vmem>>, %arg5: memref<1x256xf32, #tpu.memory_space<vmem>>, %arg6: memref<16x144xf32, #tpu.memory_space<vmem>>, %arg7: memref<1x16x256xf32, #tpu.memory_space<vmem>>, %arg8: memref<1x16x2xf32, #tpu.memory_space<vmem>>, %arg9: memref<16x290xf32, #tpu.memory_space<vmem>>) attributes {dimension_semantics = [#tpu.dimension_semantics<parallel>], iteration_bounds = array<i64: 2>, scalar_prefetch = 0 : i64, scratch_operands = 1 : i64, tpu.core_type = #tpu.core_type<tc>, window_params = [{transform_indices = @transform_0, window_bounds = array<i64: 1, 16, 256>}, {pipeline_mode = #tpu.pipeline_mode<synchronous>, transform_indices = @transform_1, window_bounds = array<i64: 16, 1>}, {pipeline_mode = #tpu.pipeline_mode<synchronous>, transform_indices = @transform_2, window_bounds = array<i64: 16, 1>}, {pipeline_mode = #tpu.pipeline_mode<synchronous>, transform_indices = @transform_3, window_bounds = array<i64: 1, 256>}, {pipeline_mode = #tpu.pipeline_mode<synchronous>, transform_indices = @transform_4, window_bounds = array<i64: 1, 256>}, {pipeline_mode = #tpu.pipeline_mode<synchronous>, transform_indices = @transform_5, window_bounds = array<i64: 16, 144>}, {transform_indices = @transform_6, window_bounds = array<i64: 1, 16, 256>}, {transform_indices = @transform_7, window_bounds = array<i64: 1, 16, 2>}]} {
    %c0 = arith.constant 0 : index
    %c0_0 = arith.constant 0 : index
    %c0_1 = arith.constant 0 : index
    %0 = vector.load %arg1[%c0, %c0_0, %c0_1] : memref<1x16x256xf32, #tpu.memory_space<vmem>>, vector<1x16x256xf32>
    %1 = vector.shape_cast %0 : vector<1x16x256xf32> to vector<16x256xf32>
    %c0_2 = arith.constant 0 : index
    %c0_3 = arith.constant 0 : index
    %2 = vector.load %arg2[%c0_2, %c0_3] : memref<16x1xf32, #tpu.memory_space<vmem>>, vector<16x1xf32>
    %3 = vector.broadcast %2 : vector<16x1xf32> to vector<16x256xf32>
    %4 = arith.mulf %1, %3 : vector<16x256xf32>
    %c0_4 = arith.constant 0 : index
    %c0_5 = arith.constant 0 : index
    %5 = vector.load %arg3[%c0_4, %c0_5] : memref<16x1xf32, #tpu.memory_space<vmem>>, vector<16x1xf32>
    %6 = vector.broadcast %5 : vector<16x1xf32> to vector<16x256xf32>
    %7 = arith.addf %4, %6 : vector<16x256xf32>
    %cst = arith.constant 0.000000e+00 : f32
    %8 = vector.broadcast %cst : f32 to vector<16x256xf32>
    %9 = arith.maximumf %7, %8 : vector<16x256xf32>
    %cst_6 = arith.constant 0.000000e+00 : f32
    %10 = vector.broadcast %cst_6 : f32 to vector<16x17xf32>
    %c0_7 = arith.constant 0 : index
    %c0_8 = arith.constant 0 : index
    %11 = vector.load %arg9[%c0_7, %c0_8] : memref<16x290xf32, #tpu.memory_space<vmem>>, vector<16x17xf32>
    tpu.vector_store %arg9[%c0_7, %c0_8], %10 {strides = array<i32>} : memref<16x290xf32, #tpu.memory_space<vmem>>, vector<16x17xf32>,
    %cst_9 = arith.constant 0.000000e+00 : f32
    %12 = vector.broadcast %cst_9 : f32 to vector<16x17xf32>
    %c0_10 = arith.constant 0 : index
    %c273 = arith.constant 273 : index
    %13 = vector.load %arg9[%c0_10, %c273] : memref<16x290xf32, #tpu.memory_space<vmem>>, vector<16x17xf32>
    tpu.vector_store %arg9[%c0_10, %c273], %12 {strides = array<i32>} : memref<16x290xf32, #tpu.memory_space<vmem>>, vector<16x17xf32>,
    %c0_11 = arith.constant 0 : index
    %c17 = arith.constant 17 : index
    %14 = vector.load %arg9[%c0_11, %c17] : memref<16x290xf32, #tpu.memory_space<vmem>>, vector<16x256xf32>
    tpu.vector_store %arg9[%c0_11, %c17], %9 {strides = array<i32>} : memref<16x290xf32, #tpu.memory_space<vmem>>, vector<16x256xf32>,
    %c0_12 = arith.constant 0 : index
    %c0_13 = arith.constant 0 : index
    %15 = vector.load %arg4[%c0_12, %c0_13] : memref<1x256xf32, #tpu.memory_space<vmem>>, vector<1x256xf32>
    %c0_14 = arith.constant 0 : index
    %c0_15 = arith.constant 0 : index
    %16 = vector.load %arg5[%c0_14, %c0_15] : memref<1x256xf32, #tpu.memory_space<vmem>>, vector<1x256xf32>
    %c0_16 = arith.constant 0 : index
    %c0_17 = arith.constant 0 : index
    %17 = vector.load %arg6[%c0_16, %c0_17] : memref<16x144xf32, #tpu.memory_space<vmem>>, vector<16x144xf32>
    %c0_18 = arith.constant 0 : index
    %c0_19 = arith.constant 0 : index
    %18 = vector.load %arg9[%c0_18, %c0_19] : memref<16x290xf32, #tpu.memory_space<vmem>>, vector<16x256xf32>
    %19 = vector.broadcast %15 : vector<1x256xf32> to vector<16x256xf32>
    %20 = arith.mulf %18, %19 : vector<16x256xf32>
    %c0_20 = arith.constant 0 : index
    %c1 = arith.constant 1 : index
    %21 = vector.load %arg9[%c0_20, %c1] : memref<16x290xf32, #tpu.memory_space<vmem>>, vector<16x256xf32>
    %c0_21 = arith.constant 0 : index
    %c2 = arith.constant 2 : index
    %22 = vector.load %arg9[%c0_21, %c2] : memref<16x290xf32, #tpu.memory_space<vmem>>, vector<16x256xf32>
    %23 = vector.broadcast %16 : vector<1x256xf32> to vector<16x256xf32>
    %24 = arith.mulf %22, %23 : vector<16x256xf32>
    %c0_22 = arith.constant 0 : index
    %c16 = arith.constant 16 : index
    %25 = vector.load %arg9[%c0_22, %c16] : memref<16x290xf32, #tpu.memory_space<vmem>>, vector<16x256xf32>
    %26 = vector.broadcast %15 : vector<1x256xf32> to vector<16x256xf32>
    %27 = arith.mulf %25, %26 : vector<16x256xf32>
    %c0_23 = arith.constant 0 : index
    %c17_24 = arith.constant 17 : index
    %28 = vector.load %arg9[%c0_23, %c17_24] : memref<16x290xf32, #tpu.memory_space<vmem>>, vector<16x256xf32>
    %c0_25 = arith.constant 0 : index
    %c18 = arith.constant 18 : index
    %29 = vector.load %arg9[%c0_25, %c18] : memref<16x290xf32, #tpu.memory_space<vmem>>, vector<16x256xf32>
    %30 = vector.broadcast %16 : vector<1x256xf32> to vector<16x256xf32>
    %31 = arith.mulf %29, %30 : vector<16x256xf32>
    %c0_26 = arith.constant 0 : index
    %c32 = arith.constant 32 : index
    %32 = vector.load %arg9[%c0_26, %c32] : memref<16x290xf32, #tpu.memory_space<vmem>>, vector<16x256xf32>
    %33 = vector.broadcast %15 : vector<1x256xf32> to vector<16x256xf32>
    %34 = arith.mulf %32, %33 : vector<16x256xf32>
    %c0_27 = arith.constant 0 : index
    %c33 = arith.constant 33 : index
    %35 = vector.load %arg9[%c0_27, %c33] : memref<16x290xf32, #tpu.memory_space<vmem>>, vector<16x256xf32>
    %c0_28 = arith.constant 0 : index
    %c34 = arith.constant 34 : index
    %36 = vector.load %arg9[%c0_28, %c34] : memref<16x290xf32, #tpu.memory_space<vmem>>, vector<16x256xf32>
    %37 = vector.broadcast %16 : vector<1x256xf32> to vector<16x256xf32>
    %38 = arith.mulf %36, %37 : vector<16x256xf32>
    %39 = tpu.concatenate %20, %21, %24, %27, %28, %31, %34, %35, %38 in 0 : vector<16x256xf32>, vector<16x256xf32>, vector<16x256xf32>, vector<16x256xf32>, vector<16x256xf32>, vector<16x256xf32>, vector<16x256xf32>, vector<16x256xf32>, vector<16x256xf32> -> vector<144x256xf32>
    %cst_29 = arith.constant dense<0.000000e+00> : vector<16x256xf32>
    %40 = tpu.matmul %17, %39, %cst_29 {dimension_numbers = #tpu.dot_dimension_numbers<[1], [0], [0], [1], [0, 0, 1, 1], [], []>} : vector<16x144xf32>, vector<144x256xf32>, vector<16x256xf32> -> vector<16x256xf32>
    %c0_30 = arith.constant 0 : index
    %c0_31 = arith.constant 0 : index
    %c0_32 = arith.constant 0 : index
    %41 = vector.load %arg7[%c0_30, %c0_31, %c0_32] : memref<1x16x256xf32, #tpu.memory_space<vmem>>, vector<1x16x256xf32>
    %42 = vector.shape_cast %41 : vector<1x16x256xf32> to vector<16x256xf32>
    %43 = vector.shape_cast %40 : vector<16x256xf32> to vector<1x16x256xf32>
    tpu.vector_store %arg7[%c0_30, %c0_31, %c0_32], %43 {strides = array<i32>} : memref<1x16x256xf32, #tpu.memory_space<vmem>>, vector<1x16x256xf32>,
    %cst_33 = arith.constant dense<0.000000e+00> : vector<16xf32>
    %44 = vector.multi_reduction <add>, %40, %cst_33 [1] : vector<16x256xf32> to vector<16xf32>
    %45 = vector.shape_cast %44 : vector<16xf32> to vector<16x1xf32>
    %46 = arith.mulf %40, %40 : vector<16x256xf32>
    %cst_34 = arith.constant dense<0.000000e+00> : vector<16xf32>
    %47 = vector.multi_reduction <add>, %46, %cst_34 [1] : vector<16x256xf32> to vector<16xf32>
    %48 = vector.shape_cast %47 : vector<16xf32> to vector<16x1xf32>
    %49 = tpu.concatenate %45, %48 in 1 : vector<16x1xf32>, vector<16x1xf32> -> vector<16x2xf32>
    %c0_35 = arith.constant 0 : index
    %c0_36 = arith.constant 0 : index
    %c0_37 = arith.constant 0 : index
    %50 = vector.load %arg8[%c0_35, %c0_36, %c0_37] : memref<1x16x2xf32, #tpu.memory_space<vmem>>, vector<1x16x2xf32>
    %51 = vector.shape_cast %50 : vector<1x16x2xf32> to vector<16x2xf32>
    %52 = vector.shape_cast %49 : vector<16x2xf32> to vector<1x16x2xf32>
    tpu.vector_store %arg8[%c0_35, %c0_36, %c0_37], %52 {strides = array<i32>} : memref<1x16x2xf32, #tpu.memory_space<vmem>>, vector<1x16x2xf32>,
    return
  }
  func.func @transform_0(%arg0: i32) -> (i32, i32, i32) {
    %c0_i32 = arith.constant 0 : i32
    %c0_i32_0 = arith.constant 0 : i32
    %c0_i32_1 = arith.constant 0 : i32
    return %arg0, %c0_i32, %c0_i32_0 : i32, i32, i32
  }
  func.func @transform_1(%arg0: i32) -> (i32, i32) {
    %c0_i32 = arith.constant 0 : i32
    %c0_i32_0 = arith.constant 0 : i32
    %c0_i32_1 = arith.constant 0 : i32
    return %c0_i32, %c0_i32_0 : i32, i32
  }
  func.func @transform_2(%arg0: i32) -> (i32, i32) {
    %c0_i32 = arith.constant 0 : i32
    %c0_i32_0 = arith.constant 0 : i32
    %c0_i32_1 = arith.constant 0 : i32
    return %c0_i32, %c0_i32_0 : i32, i32
  }
  func.func @transform_3(%arg0: i32) -> (i32, i32) {
    %c0_i32 = arith.constant 0 : i32
    %c0_i32_0 = arith.constant 0 : i32
    %c0_i32_1 = arith.constant 0 : i32
    return %c0_i32, %c0_i32_0 : i32, i32
  }
  func.func @transform_4(%arg0: i32) -> (i32, i32) {
    %c0_i32 = arith.constant 0 : i32
    %c0_i32_0 = arith.constant 0 : i32
    %c0_i32_1 = arith.constant 0 : i32
    return %c0_i32, %c0_i32_0 : i32, i32
  }
  func.func @transform_5(%arg0: i32) -> (i32, i32) {
    %c0_i32 = arith.constant 0 : i32
    %c0_i32_0 = arith.constant 0 : i32
    %c0_i32_1 = arith.constant 0 : i32
    return %c0_i32, %c0_i32_0 : i32, i32
  }
  func.func @transform_6(%arg0: i32) -> (i32, i32, i32) {
    %c0_i32 = arith.constant 0 : i32
    %c0_i32_0 = arith.constant 0 : i32
    %c0_i32_1 = arith.constant 0 : i32
    return %arg0, %c0_i32, %c0_i32_0 : i32, i32, i32
  }
  func.func @transform_7(%arg0: i32) -> (i32, i32, i32) {
    %c0_i32 = arith.constant 0 : i32
    %c0_i32_0 = arith.constant 0 : i32
    %c0_i32_1 = arith.constant 0 : i32
    return %arg0, %c0_i32, %c0_i32_0 : i32, i32, i32
  }
}

module attributes {stable_mosaic.version = 11 : i64} {
  func.func @bn_relu_kernel(%arg0: i32, %arg1: memref<1x16x256xf32, #tpu.memory_space<vmem>>, %arg2: memref<16x1xf32, #tpu.memory_space<vmem>>, %arg3: memref<16x1xf32, #tpu.memory_space<vmem>>, %arg4: memref<1x16x256xf32, #tpu.memory_space<vmem>>) attributes {dimension_semantics = [#tpu.dimension_semantics<parallel>], iteration_bounds = array<i64: 2>, scalar_prefetch = 0 : i64, scratch_operands = 0 : i64, tpu.core_type = #tpu.core_type<tc>, window_params = [{transform_indices = @transform_0, window_bounds = array<i64: 1, 16, 256>}, {pipeline_mode = #tpu.pipeline_mode<synchronous>, transform_indices = @transform_1, window_bounds = array<i64: 16, 1>}, {pipeline_mode = #tpu.pipeline_mode<synchronous>, transform_indices = @transform_2, window_bounds = array<i64: 16, 1>}, {transform_indices = @transform_3, window_bounds = array<i64: 1, 16, 256>}]} {
    %c0 = arith.constant 0 : index
    %c0_0 = arith.constant 0 : index
    %c0_1 = arith.constant 0 : index
    %0 = vector.load %arg1[%c0, %c0_0, %c0_1] : memref<1x16x256xf32, #tpu.memory_space<vmem>>, vector<1x16x256xf32>
    %1 = vector.shape_cast %0 : vector<1x16x256xf32> to vector<16x256xf32>
    %c0_2 = arith.constant 0 : index
    %c0_3 = arith.constant 0 : index
    %2 = vector.load %arg2[%c0_2, %c0_3] : memref<16x1xf32, #tpu.memory_space<vmem>>, vector<16x1xf32>
    %3 = vector.broadcast %2 : vector<16x1xf32> to vector<16x256xf32>
    %4 = arith.mulf %1, %3 : vector<16x256xf32>
    %c0_4 = arith.constant 0 : index
    %c0_5 = arith.constant 0 : index
    %5 = vector.load %arg3[%c0_4, %c0_5] : memref<16x1xf32, #tpu.memory_space<vmem>>, vector<16x1xf32>
    %6 = vector.broadcast %5 : vector<16x1xf32> to vector<16x256xf32>
    %7 = arith.addf %4, %6 : vector<16x256xf32>
    %cst = arith.constant 0.000000e+00 : f32
    %8 = vector.broadcast %cst : f32 to vector<16x256xf32>
    %9 = arith.maximumf %7, %8 : vector<16x256xf32>
    %c0_6 = arith.constant 0 : index
    %c0_7 = arith.constant 0 : index
    %c0_8 = arith.constant 0 : index
    %10 = vector.load %arg4[%c0_6, %c0_7, %c0_8] : memref<1x16x256xf32, #tpu.memory_space<vmem>>, vector<1x16x256xf32>
    %11 = vector.shape_cast %10 : vector<1x16x256xf32> to vector<16x256xf32>
    %12 = vector.shape_cast %9 : vector<16x256xf32> to vector<1x16x256xf32>
    tpu.vector_store %arg4[%c0_6, %c0_7, %c0_8], %12 {strides = array<i32>} : memref<1x16x256xf32, #tpu.memory_space<vmem>>, vector<1x16x256xf32>,
    return
  }
  func.func @transform_0(%arg0: i32) -> (i32, i32, i32) {
    %c0_i32 = arith.constant 0 : i32
    %c0_i32_0 = arith.constant 0 : i32
    %c0_i32_1 = arith.constant 0 : i32
    return %arg0, %c0_i32, %c0_i32_0 : i32, i32, i32
  }
  func.func @transform_1(%arg0: i32) -> (i32, i32) {
    %c0_i32 = arith.constant 0 : i32
    %c0_i32_0 = arith.constant 0 : i32
    %c0_i32_1 = arith.constant 0 : i32
    return %c0_i32, %c0_i32_0 : i32, i32
  }
  func.func @transform_2(%arg0: i32) -> (i32, i32) {
    %c0_i32 = arith.constant 0 : i32
    %c0_i32_0 = arith.constant 0 : i32
    %c0_i32_1 = arith.constant 0 : i32
    return %c0_i32, %c0_i32_0 : i32, i32
  }
  func.func @transform_3(%arg0: i32) -> (i32, i32, i32) {
    %c0_i32 = arith.constant 0 : i32
    %c0_i32_0 = arith.constant 0 : i32
    %c0_i32_1 = arith.constant 0 : i32
    return %arg0, %c0_i32, %c0_i32_0 : i32, i32, i32
  }
}

</mosaic_0001>

<bundles_post_ra>
// kernel: decoder_block_forward.4
= control target key start
LH: loop header
LB: loop body
LE: loop exit
PB: predicated region body
PF: predicated region fallthrough
CT: control target
= control target key end

     0   :  { %s530_s12 = smov 0   ;;  %s615_s0 = inlined_call_operand.vmem [shape: f32[2,32,64], index: 0, kind: input, shape index: {}]   ;;  %s616_s1 = inlined_call_operand.vmem [shape: f32[64,32], index: 1, kind: input, shape index: {}]   ;;  %s617_s2 = inlined_call_operand.vmem [shape: f32[64,1], index: 2, kind: input, shape index: {}]   ;;  %s618_s3 = inlined_call_operand.vmem [shape: f32[2,64,64], index: 3, kind: output, shape index: {}]  }
   0x1 LB: > { %s425_s13 = sadd.s32 4294967295, %s507_s12   ;;  %p429_p0 = scmp.ge.s32.totalorder %s507_s12, 1  ;;  %s507_s12 = sphi %s530_s12, %s13_s12  }
   0x2   : > { %p137_p1 = scmp.lt.s32.totalorder %s507_s12, 3 }
   0x4   : > { %p138_p2 = pnand %p429_p0, %p137_p1 }
   0x5   : > { %p161_p3 = scmp.lt.s32.totalorder (!%p138_p2), %s425_s13, 1  ;;  %v171_v0 = vld [vmem:[%s616_s1] sm:$0xff] (!%p138_p2)  ;;  %vm231_vm0 = vcmask (!%p138_p2), 261120   ;;  %v509_v2 = vmov (!%p138_p2), 0   ;;  %v185_v3 = vld [vmem:[%s617_s2 + $0x10] sm:$0xff] (!%p138_p2)  ;;  %v186_v5 = vld [vmem:[%s617_s2 + $0x18] sm:$0xff] (!%p138_p2) }
   0x6   : > { %141 = sbr.rel (%p138_p2) target bundleno = 247 (0xf7), region = 32  ;;  %v175_v1 = vld [vmem:[%s616_s1 + $0x20] sm:$0xff] (!%p138_p2)  ;;  %466 = vmatprep.mubr.msk.f32.mxu0 (!%p138_p2), %vm231_vm0, %v171_v0  ;;  %500 = vset.pattern.permute.xlu1 (!%p138_p2), %v509_v2  ;;  %v184_v6 = vld [vmem:[%s617_s2 + $0x8] sm:$0xff] (!%p138_p2)  ;;  %v190_v15 = vld [vmem:[%s617_s2 + $0x38] sm:$0xff] (!%p138_p2)  ;;  %vm361_vm1 = vcmask (!%p138_p2), 523264  }
   0x7   : > { %472 = vmatprep.mubr.msk.f32.mxu1 (!%p138_p2), %vm231_vm0, %v175_v1  ;;  %499 = vset.pattern.permute.xlu0 (!%p138_p2), %v509_v2  ;;  %v183_v4 = vld [vmem:[%s617_s2] sm:$0xff] (!%p138_p2)  ;;  %v188_v13 = vld [vmem:[%s617_s2 + $0x28] sm:$0xff] (!%p138_p2)  ;;  %v189_v16 = vld [vmem:[%s617_s2 + $0x30] sm:$0xff] (!%p138_p2) }
   0x8   : > { %203 = vperm.xlu1 (!%p138_p2), %500, %v185_v3   ;;  %193 = vperm.xlu0 (!%p138_p2), %499, %v183_v4   ;;  %v187_v14 = vld [vmem:[%s617_s2 + $0x20] sm:$0xff] (!%p138_p2)  ;;  %v172_v17 = vld [vmem:[%s616_s1 + $0x8] sm:$0xff] (!%p138_p2)  ;;  %v173_v19 = vld [vmem:[%s616_s1 + $0x10] sm:$0xff] (!%p138_p2) }
   0x9   : > { %v176_v18 = vld [vmem:[%s616_s1 + $0x28] sm:$0xff] (!%p138_p2)  ;;  %v177_v20 = vld [vmem:[%s616_s1 + $0x30] sm:$0xff] (!%p138_p2)  ;;  %v174_v21 = vld [vmem:[%s616_s1 + $0x18] sm:$0xff] (!%p138_p2) }
   0xa   : > { %v178_v22 = vld [vmem:[%s616_s1 + $0x38] sm:$0xff] (!%p138_p2) }
   0xc   : > { %208 = vperm.xlu1 (!%p138_p2), %500, %v186_v5   ;;  %198 = vperm.xlu0 (!%p138_p2), %499, %v184_v6  }
   0xd   : > { %s620_s13 = smov (!%p161_p3, %s425_s13), 1 }
   0xe   : > { %s444_s22 = sshll.u32 %s620_s13, 5  ;;  %s445_s25 = sshll.u32 %s620_s13, 6 }
   0xf   : > { %s165_s27 = scalar_lea.vmem %s615_s0, %s444_s22  ;;  %s170_s28 = scalar_lea.vmem %s618_s3, %s445_s25 }
  0x10   : > { %v179_v7 = vld [vmem:[%s165_s27] sm:$0xff]  ;;  %v180_v8 = vld [vmem:[%s165_s27 + $0x8] sm:$0xff]  ;;  %v181_v9 = vld [vmem:[%s165_s27 + $0x10] sm:$0xff]  ;;  %218 = vperm.xlu1 %500, %v188_v13   ;;  %213 = vperm.xlu0 %499, %v187_v14  }
  0x11   : > { %v478_v10 = vpack.c.bf16 %v180_v8, %v179_v7  ;;  %v182_v11 = vld [vmem:[%s165_s27 + $0x18] sm:$0xff] }
  0x12   : > { %v482_v12 = vpack.c.bf16 %v182_v11, %v181_v9 }
  0x13   : > { %479 = vmatprep.subr.bf16.mxu0 %v478_v10  ;;  %486 = vmatprep.subr.bf16.mxu1 %v478_v10 }
  0x14   : > { %481 = vmatpush3.bf16.msra.mxu0 %v478_v10  ;;  %488 = vmatpush3.bf16.msra.mxu1 %v478_v10 }
  0x15   : > { %483 = vmatprep.subr.bf16.mxu0 %v482_v12  ;;  %487 = vmatprep.subr.bf16.mxu1 %v482_v12 }
  0x16   : > { %228 = vperm.xlu1 %500, %v190_v15   ;;  %223 = vperm.xlu0 %499, %v189_v16  }
  0x18   : > { %485 = vmatpush3.bf16.msra.mxu0 %v482_v12  ;;  %489 = vmatpush3.bf16.msra.mxu1 %v482_v12 }
  0x1b   : > { %467 = vmatmul.mubr.msk.f32.vlgmr.msra.gmra.mrb[0].mxu0 %vm231_vm0, %v172_v17  ;;  %473 = vmatmul.mubr.msk.f32.vlgmr.msra.gmra.mrb[0].mxu1 %vm231_vm0, %v176_v18 }
  0x1c   : > { %469 = vmatprep.mubr.msk.f32.mxu0 %vm231_vm0, %v173_v19  ;;  %475 = vmatprep.mubr.msk.f32.mxu1 %vm231_vm0, %v177_v20 }
  0x1f   : > { %470 = vmatmul.mubr.msk.f32.gmra.mrb[2].mxu0 %vm231_vm0, %v174_v21  ;;  %476 = vmatmul.mubr.msk.f32.gmra.mrb[2].mxu1 %vm231_vm0, %v178_v22 }
  0x87   : > { %v204_v23 = vpop.permute.xlu1 %203  ;;  %v194_v24 = vpop.permute.xlu0 %193 }
  0x8b   : > { %v209_v25 = vpop.permute.xlu1 %208  ;;  %v199_v26 = vpop.permute.xlu0 %198 }
  0x8f   : > { %v219_v27 = vpop.permute.xlu1 %218  ;;  %v214_v28 = vpop.permute.xlu0 %213 }
  0x95   : > { %v229_v37 = vpop.permute.xlu1 %228  ;;  %v224_v38 = vpop.permute.xlu0 %223 }
  0xee   : > { %v468_v29 = vpop.f32.mrb[0].mxu0  ;;  %v474_v30 = vpop.f32.mrb[0].mxu1 }
  0xef   : > { %v328_v31 = vadd.f32 %v468_v29, %v199_v26  ;;  %v348_v32 = vadd.f32 %v474_v30, %v219_v27  ;;  %v322_v33 = vpop.f32.mrb[1].mxu0  ;;  %v342_v34 = vpop.f32.mrb[1].mxu1 }
  0xf0   : > { %v323_v35 = vadd.f32 %v322_v33, %v194_v24  ;;  %v343_v36 = vadd.f32 %v342_v34, %v214_v28 }
  0xf1   : > { %363 = vst.msk [vmem:[%s170_s28 + $0x8] sm:$0xff] %vm361_vm1, %v328_v31  ;;  %367 = vst.msk [vmem:[%s170_s28 + $0x28] sm:$0xff] %vm361_vm1, %v348_v32 }
  0xf2   : > { %362 = vst.msk [vmem:[%s170_s28] sm:$0xff] %vm361_vm1, %v323_v35  ;;  %366 = vst.msk [vmem:[%s170_s28 + $0x20] sm:$0xff] %vm361_vm1, %v343_v36  ;;  %v471_v39 = vpop.f32.mrb[2].mxu0  ;;  %v477_v40 = vpop.f32.mrb[2].mxu1 }
  0xf3   : > { %v338_v41 = vadd.f32 %v471_v39, %v209_v25  ;;  %v358_v42 = vadd.f32 %v477_v40, %v229_v37  ;;  %v332_v43 = vpop.f32.mrb[3].mxu0  ;;  %v352_v44 = vpop.f32.mrb[3].mxu1 }
  0xf4   : > { %v333_v45 = vadd.f32 %v332_v43, %v204_v23  ;;  %v353_v46 = vadd.f32 %v352_v44, %v224_v38 }
  0xf5   : > { %365 = vst.msk [vmem:[%s170_s28 + $0x18] sm:$0xff] %vm361_vm1, %v338_v41  ;;  %369 = vst.msk [vmem:[%s170_s28 + $0x38] sm:$0xff] %vm361_vm1, %v358_v42 }
  0xf6   : > { %364 = vst.msk [vmem:[%s170_s28 + $0x10] sm:$0xff] %vm361_vm1, %v333_v45  ;;  %368 = vst.msk [vmem:[%s170_s28 + $0x30] sm:$0xff] %vm361_vm1, %v353_v46 }
  0xf7 PF: > { %s13_s12 = sadd.s32 1, %s507_s12  }
  0xf8   : > { %p10_p4 = scmp.ge.s32.totalorder %s13_s12, 4  }
  0xfa   :  { %12 = sbr.rel (!%p10_p4) target bundleno = 1 (0x1), region = 62 }

// kernel: decoder_block_forward.5
= control target key start
LH: loop header
LB: loop body
LE: loop exit
PB: predicated region body
PF: predicated region fallthrough
CT: control target
= control target key end

     0   :  { %s1612_s21 = smov 0   ;;  %s2187_s0 = inlined_call_operand.vmem [shape: f32[2,16,256], index: 0, kind: input, shape index: {}]   ;;  %s2188_s1 = inlined_call_operand.vmem [shape: f32[2,16,256], index: 1, kind: input, shape index: {}]   ;;  %s2189_s2 = inlined_call_operand.vmem [shape: f32[1,256], index: 2, kind: input, shape index: {}]   ;;  %s2190_s3 = inlined_call_operand.vmem [shape: f32[1,256], index: 3, kind: input, shape index: {}]   ;;  %s2191_s4 = inlined_call_operand.vmem [shape: f32[16,288], index: 4, kind: input, shape index: {}]   ;;  %s2192_s5 = inlined_call_operand.vmem [shape: f32[2,16,256], index: 5, kind: output, shape index: {0}]   ;;  %s2193_s6 = inlined_call_operand.vmem [shape: f32[2,16,2], index: 6, kind: output, shape index: {1}]  }
   0x1 LB: > { %s1194_s22 = sadd.s32 4294967295, %s1560_s21   ;;  %p1198_p0 = scmp.ge.s32.totalorder %s1560_s21, 1  ;;  %s1560_s21 = sphi %s1612_s21, %s17_s21  }
   0x2   : > { %p225_p1 = scmp.lt.s32.totalorder %s1560_s21, 3 }
   0x4   : > { %p226_p2 = pnand %p1198_p0, %p225_p1 }
   0x5   : > { %p265_p3 = scmp.lt.s32.totalorder (!%p226_p2), %s1194_s22, 1  ;;  %vm285_vm0 = vcmask (!%p226_p2), 138240   ;;  %vm290_vm1 = vcmask (!%p226_p2), 277640   ;;  %v1562_v0 = vmov (!%p226_p2), 0.0   ;;  %s1563_s27 = smov (!%p226_p2), 17   ;;  %v373_v3 = vlaneseq (!%p226_p2) }
   0x6   : > { %229 = sbr.rel (%p226_p2) target bundleno = 739 (0x2e3), region = 40  ;;  %287 = vst.msk [vmem:[#allocation2 + $0x18] sm:$0xff] (!%p226_p2), %vm285_vm0, %v1562_v0  ;;  %286 = vst.msk [vmem:[#allocation2] sm:$0xff] (!%p226_p2), %vm285_vm0, %v1562_v0  ;;  %1056 = vmatprep.mubr.f32.mxu0 (!%p226_p2), %v1562_v0  ;;  %v357_v13 = vld [vmem:[%s2190_s3] sm:$0x3] (!%p226_p2)  ;;  %s1564_s11 = smov (!%p226_p2), 2  }
   0x7   : > { %288 = vst.msk [vmem:[#allocation2 + $0x30] sm:$0xff] (!%p226_p2), %vm285_vm0, %v1562_v0  ;;  %289 = vst.msk [vmem:[#allocation2 + $0x48] sm:$0xff] (!%p226_p2), %vm285_vm0, %v1562_v0  ;;  %v374_v6 = vshrl.u32 (!%p226_p2), %v373_v3, 7  ;;  %v356_v16 = vld [vmem:[%s2189_s2] sm:$0x3] (!%p226_p2)  ;;  %s1565_s12 = smov (!%p226_p2), 16  }
   0x8   : > { %292 = vst.msk [vmem:[#allocation2 + $0x28] sm:$0xff] (!%p226_p2), %vm290_vm1, %v1562_v0  ;;  %291 = vst.msk [vmem:[#allocation2 + $0x10] sm:$0xff] (!%p226_p2), %vm290_vm1, %v1562_v0  ;;  %s1566_s13 = smov (!%p226_p2), 18   ;;  %s1567_s14 = smov (!%p226_p2), 32   ;;  %vm319_vm2 = vcmask (!%p226_p2), 1047688   ;;  %vm471_vm3 = vcmask (!%p226_p2), 261120  }
   0x9   : > { %293 = vst.msk [vmem:[#allocation2 + $0x40] sm:$0xff] (!%p226_p2), %vm290_vm1, %v1562_v0  ;;  %294 = vst.msk [vmem:[#allocation2 + $0x58] sm:$0xff] (!%p226_p2), %vm290_vm1, %v1562_v0  ;;  %v379_v9 = vsub.s32 (!%p226_p2), 1, %v374_v6  ;;  %v375_v10 = vsub.s32 (!%p226_p2), 0, %v374_v6  ;;  %s1568_s15 = smov (!%p226_p2), 34   ;;  %s1569_s16 = smov (!%p226_p2), 127  }
   0xa   : > { %s1570_s17 = smov (!%p226_p2), 111   ;;  %vm492_vm4 = vcmask (!%p226_p2), 277504   ;;  %s1571_s18 = smov (!%p226_p2), 95   ;;  %vm408_vm5 = vcmask (!%p226_p2), 15360   ;;  %vm429_vm6 = vcmask (!%p226_p2), 130048   ;;  %vm450_vm7 = vcmask (!%p226_p2), 146432  }
   0xb   : > { %v403_v14 = vrot.slane (!%p226_p2), %v357_v13, %v379_v9  ;;  %v399_v15 = vrot.slane (!%p226_p2), %v357_v13, %v375_v10  ;;  %v380_v17 = vrot.slane (!%p226_p2), %v356_v16, %v379_v9  ;;  %v1652_v18 = vrot.slane (!%p226_p2), %v356_v16, %v375_v10  ;;  %s1572_s19 = smov (!%p226_p2), 126   ;;  %s1573_s20 = smov (!%p226_p2), 112  }
   0xc   : > { %s1574_s24 = smov (!%p226_p2), 110   ;;  %s1575_s25 = smov (!%p226_p2), 96   ;;  %vm545_vm8 = vcmask (!%p226_p2), 1039360   ;;  %vm598_vm9 = vcmask (!%p226_p2), 1031168   ;;  %vm651_vm10 = vcmask (!%p226_p2), 916480   ;;  %vm692_vm11 = vcmask (!%p226_p2), 908288  }
   0xd   : > { %s2195_s22 = smov (!%p265_p3, %s1194_s22), 1  ;;  %vm745_vm12 = vcmask 900096   ;;  %vm839_vm13 = vcmask 777216   ;;  %vm798_vm14 = vcmask 785408   ;;  %vm892_vm15 = vcmask 769024  }
   0xe   : > { %s1636_s23 = sshll.u32 %s2195_s22, 5 }
   0xf   : > { %s269_s26 = scalar_lea.vmem %s2187_s0, %s1636_s23  ;;  %s274_s30 = scalar_lea.vmem %s2188_s1, %s1636_s23 }
  0x10   : > { %v297_v1 = vld [vmem:[%s269_s26 + $0x10] sm:$0xff]  ;;  %v295_v2 = vld [vmem:[%s269_s26] sm:$0xff]  ;;  %v298_v4 = vld [vmem:[%s269_s26 + $0x18] sm:$0xff] }
  0x11   : > { %307 = vrot.lane.b32.xlu1 %v297_v1, %s1563_s27  ;;  %303 = vrot.lane.b32.xlu0 %v295_v2, %s1563_s27  ;;  %v296_v5 = vld [vmem:[%s269_s26 + $0x8] sm:$0xff]  ;;  %v326_v8 = vld [vmem:[%s274_s30] sm:$0xff]  ;;  %s1576_s26 = smov 94  }
  0x12   : > { %v327_v7 = vld [vmem:[%s274_s30 + $0x8] sm:$0xff]  ;;  %v329_v11 = vld [vmem:[%s274_s30 + $0x18] sm:$0xff]  ;;  %v328_v12 = vld [vmem:[%s274_s30 + $0x10] sm:$0xff] }
  0x15   : > { %309 = vrot.lane.b32.xlu1 %v298_v4, %s1563_s27  ;;  %305 = vrot.lane.b32.xlu0 %v296_v5, %s1563_s27 }
  0x19   : > { %336 = vrot.lane.b32.xlu1 %v327_v7, %s1563_s27  ;;  %334 = vrot.lane.b32.xlu0 %v326_v8, %s1563_s27 }
  0x1d   : > { %340 = vrot.lane.b32.xlu1 %v329_v11, %s1563_s27  ;;  %338 = vrot.lane.b32.xlu0 %v328_v12, %s1563_s27 }
  0x21   : > { %406 = vrot.lane.b32.xlu1 %v403_v14, %s1564_s11  ;;  %404 = vrot.lane.b32.xlu0 %v399_v15, %s1564_s11 }
  0x25   : > { %427 = vrot.lane.b32.xlu1 %v380_v17, %s1565_s12  ;;  %425 = vrot.lane.b32.xlu0 %v1652_v18, %s1565_s12 }
  0x29   : > { %448 = vrot.lane.b32.xlu1 %v403_v14, %s1566_s13  ;;  %446 = vrot.lane.b32.xlu0 %v399_v15, %s1566_s13 }
  0x2d   : > { %469 = vrot.lane.b32.xlu1 %v380_v17, %s1567_s14  ;;  %467 = vrot.lane.b32.xlu0 %v1652_v18, %s1567_s14 }
  0x31   : > { %490 = vrot.lane.b32.xlu1 %v403_v14, %s1568_s15  ;;  %488 = vrot.lane.b32.xlu0 %v399_v15, %s1568_s15 }
  0x83   : > { %v308_v19 = vpop.permute.xlu1 %307  ;;  %v304_v20 = vpop.permute.xlu0 %303 }
  0x84   : > { %323 = vst.msk [vmem:[#allocation2 + $0x18] sm:$0xff] %vm319_vm2, %v308_v19  ;;  %320 = vst.msk [vmem:[#allocation2] sm:$0xff] %vm319_vm2, %v304_v20 }
  0x87   : > { %v310_v21 = vpop.permute.xlu1 %309  ;;  %v306_v22 = vpop.permute.xlu0 %305 }
  0x88   : > { %v1659_v23 = vsel %vm285_vm0, %v308_v19, %v310_v21  ;;  %325 = vst.msk [vmem:[#allocation2 + $0x28] sm:$0xff] %vm285_vm0, %v310_v21  ;;  %v1663_v24 = vsel %vm285_vm0, %v304_v20, %v306_v22  ;;  %322 = vst.msk [vmem:[#allocation2 + $0x10] sm:$0xff] %vm285_vm0, %v306_v22 }
  0x89   : > { %v384_v25 = vmul.f32 %v380_v17, %v1663_v24  ;;  %v386_v26 = vmul.f32 %v380_v17, %v1659_v23 }
  0x8b   : > { %v337_v27 = vpop.permute.xlu1 %336  ;;  %v335_v28 = vpop.permute.xlu0 %334  ;;  %v1668_v29 = vld [vmem:[#allocation2] sm:$0xff]  ;;  %v1670_v30 = vld [vmem:[#allocation2 + $0x18] sm:$0xff]  ;;  %v1215_v31 = vpack.c.bf16 %v386_v26, %v384_v25 }
  0x8c   : > { %352 = vst.msk [vmem:[#allocation2 + $0x40] sm:$0xff] %vm285_vm0, %v337_v27  ;;  %v1674_v32 = vsel %vm285_vm0, %v335_v28, %v337_v27  ;;  %v1679_v33 = vpack.i.bf16 %v1670_v30, %v1668_v29  ;;  %v383_v34 = vmul.f32 %v1652_v18, %v1668_v29  ;;  %v385_v35 = vmul.f32 %v1652_v18, %v1670_v30 }
  0x8d   : > { %350 = vst.msk [vmem:[#allocation2 + $0x30] sm:$0xff] %vm319_vm2, %v335_v28  ;;  %1216 = vmatprep.subr.bf16.mxu1 %v1215_v31  ;;  %v388_v41 = vmul.f32 %v380_v17, %v1674_v32 }
  0x8e   : > { %1315 = vrot.lane.b32.xlu0 %v1679_v33, %s1569_s16  ;;  %v1217_v38 = vpack.c.bf16 %v385_v35, %v383_v34 }
  0x8f   : > { %v341_v36 = vpop.permute.xlu1 %340  ;;  %v339_v37 = vpop.permute.xlu0 %338  ;;  %v1692_v40 = vld [vmem:[#allocation2 + $0x10] sm:$0xff]  ;;  %v1735_v59 = vld [vmem:[#allocation2 + $0x28] sm:$0xff] }
  0x90   : > { %355 = vst.msk [vmem:[#allocation2 + $0x58] sm:$0xff] %vm285_vm0, %v341_v36  ;;  %v1689_v39 = vsel %vm285_vm0, %v339_v37, %v341_v36  ;;  %1218 = vmatpush1.bf16.msra.mxu1 %v1217_v38  ;;  %v1334_v46 = vpack.i.bf16 %v1692_v40, %v1663_v24  ;;  %v1339_v62 = vpack.i.bf16 %v1735_v59, %v1659_v23  ;;  %vm1089_vm0 = vcmask 7168  }
  0x91   : > { %353 = vst.msk [vmem:[#allocation2 + $0x48] sm:$0xff] %vm319_vm2, %v339_v37  ;;  %v390_v42 = vmul.f32 %v380_v17, %v1689_v39 }
  0x92   : > { %1325 = vrot.lane.b32.xlu0 %v1679_v33, %s1570_s17 }
  0x93   : > { %v1698_v43 = vpop.permute.xlu1 %406  ;;  %v1700_v44 = vpop.permute.xlu0 %404  ;;  %v1219_v45 = vpack.c.bf16 %v390_v42, %v388_v41  ;;  %v1744_v63 = vld [vmem:[#allocation2 + $0x40] sm:$0xff] }
  0x94   : > { %v1705_v47 = vld [vmem:[#allocation2 + $0x30] sm:$0xff]  ;;  %v1755_v4 = vpack.i.bf16 %v1744_v63, %v1674_v32  ;;  %v413_v5 = vmul.f32 %v1700_v44, %v1668_v29  ;;  %v416_v6 = vmul.f32 %v1700_v44, %v1670_v30 }
  0x95   : > { %1220 = vmatprep.subr.bf16.mxu1 %v1219_v45  ;;  %v387_v54 = vmul.f32 %v1652_v18, %v1705_v47 }
  0x96   : > { %1335 = vrot.lane.b32.xlu0 %v1334_v46, %s1569_s16  ;;  %v1384_v17 = vpack.i.bf16 %v416_v6, %v413_v5 }
  0x97   : > { %v1707_v48 = vpop.permute.xlu1 %427  ;;  %v1709_v49 = vpop.permute.xlu0 %425  ;;  %v1713_v51 = vld [vmem:[#allocation2 + $0x58] sm:$0xff] }
  0x98   : > { %v1711_v50 = vld [vmem:[#allocation2 + $0x48] sm:$0xff]  ;;  %v1721_v53 = vpack.i.bf16 %v1713_v51, %v1689_v39  ;;  %v434_v10 = vmul.f32 %v1709_v49, %v1668_v29  ;;  %v437_v12 = vmul.f32 %v1709_v49, %v1670_v30 }
  0x99   : > { %v1717_v52 = vpack.i.bf16 %v1711_v50, %v1705_v47  ;;  %v389_v55 = vmul.f32 %v1652_v18, %v1711_v50 }
  0x9a   : > { %1350 = vrot.lane.b32.xlu0 %v1721_v53, %s1569_s16  ;;  %v1394_v25 = vpack.i.bf16 %v437_v12, %v434_v10  ;;  %v419_v12 = vmul.f32 %v1700_v44, %v1705_v47 }
  0x9b   : > { %1320 = vrot.lane.b32.xlu1 %v1717_v52, %s1569_s16  ;;  %v1731_v56 = vpop.permute.xlu1 %448  ;;  %v1733_v57 = vpop.permute.xlu0 %446  ;;  %v1221_v58 = vpack.c.bf16 %v389_v55, %v387_v54 }
  0x9c   : > { %v455_v26 = vmul.f32 %v1733_v57, %v1668_v29  ;;  %v458_v28 = vmul.f32 %v1733_v57, %v1670_v30 }
  0x9d   : > { %1222 = vmatpush1.bf16.msra.mxu1 %v1221_v58  ;;  %v409_v58 = vsel %vm408_vm5, %v1700_v44, %v1698_v43 }
  0x9e   : > { %1355 = vrot.lane.b32.xlu0 %v1334_v46, %s1570_s17  ;;  %v1404_v5 = vpack.i.bf16 %v458_v28, %v455_v26  ;;  %v443_v28 = vmul.f32 %v1709_v49, %v1711_v50 }
  0x9f   : > { %1330 = vrot.lane.b32.xlu1 %v1717_v52, %s1570_s17  ;;  %v470_v60 = vpop.permute.xlu1 %469  ;;  %v1740_v61 = vpop.permute.xlu0 %467 }
  0xa0   : > { %v472_v1 = vsel %vm471_vm3, %v1740_v61, %v470_v60  ;;  %v1783_v14 = vmul.f32 %v470_v60, %v1692_v40  ;;  %v1789_v16 = vmul.f32 %v470_v60, %v1713_v51  ;;  %v1811_v27 = vmul.f32 %v470_v60, %v1735_v59 }
  0xa1   : > { %v1773_v11 = vmul.f32 %v472_v1, %v1663_v24  ;;  %v1786_v15 = vmul.f32 %v472_v1, %v1689_v39  ;;  %v1804_v22 = vmul.f32 %v472_v1, %v1659_v23  ;;  %v1818_v34 = vmul.f32 %v472_v1, %v1674_v32 }
  0xa2   : > { %1370 = vrot.lane.b32.xlu0 %v1721_v53, %s1570_s17  ;;  %v1821_v35 = vmul.f32 %v470_v60, %v1744_v63  ;;  %v422_v60 = vmul.f32 %v1700_v44, %v1711_v50  ;;  %v476_v6 = vmul.f32 %v1740_v61, %v1668_v29  ;;  %v479_v10 = vmul.f32 %v1740_v61, %v1670_v30 }
  0xa3   : > { %1340 = vrot.lane.b32.xlu1 %v1339_v62, %s1569_s16  ;;  %v1751_v2 = vpop.permute.xlu1 %490  ;;  %v489_v3 = vpop.permute.xlu0 %488  ;;  %v1504_v18 = vpack.i.bf16 %v1783_v14, %v1773_v11  ;;  %v1519_v20 = vpack.i.bf16 %v1789_v16, %v1786_v15  ;;  %v1509_v36 = vpack.i.bf16 %v1811_v27, %v1804_v22 }
  0xa4   : > { %v1762_v7 = vmul.f32 %v489_v3, %v1668_v29  ;;  %v1765_v8 = vmul.f32 %v489_v3, %v1670_v30  ;;  %v1768_v9 = vsel %vm492_vm4, %v489_v3, %v1751_v2  ;;  %v1801_v21 = vmul.f32 %v1751_v2, %v1692_v40 }
  0xa5   : > { %v1795_v19 = vmul.f32 %v1768_v9, %v1663_v24  ;;  %v1827_v37 = vmul.f32 %v1768_v9, %v1659_v23  ;;  %v1831_v38 = vmul.f32 %v1751_v2, %v1735_v59  ;;  %v1514_v41 = vpack.i.bf16 %v1821_v35, %v1818_v34 }
  0xa6   : > { %1375 = vrot.lane.b32.xlu0 %v1334_v46, %s1571_s18  ;;  %v1469_v13 = vpack.i.bf16 %v1765_v8, %v1762_v7  ;;  %v1837_v42 = vmul.f32 %v1768_v9, %v1689_v39  ;;  %v1841_v45 = vmul.f32 %v1751_v2, %v1713_v51  ;;  %v1849_v54 = vmul.f32 %v489_v3, %v1705_v47 }
  0xa7   : > { %1345 = vrot.lane.b32.xlu1 %v1755_v4, %s1569_s16  ;;  %v1524_v31 = vpack.i.bf16 %v1801_v21, %v1795_v19  ;;  %v1529_v46 = vpack.i.bf16 %v1831_v38, %v1827_v37  ;;  %v1852_v55 = vmul.f32 %v489_v3, %v1711_v50  ;;  %v1389_v29 = vpack.i.bf16 %v422_v60, %v419_v12 }
  0xa8   : > { %v1544_v1 = vpack.i.bf16 %v1841_v45, %v1837_v42  ;;  %v1414_v26 = vpack.i.bf16 %v479_v10, %v476_v6  ;;  %v440_v30 = vmul.f32 %v1709_v49, %v1705_v47  ;;  %v430_v60 = vsel %vm429_vm6, %v1709_v49, %v1707_v48 }
  0xa9   : > { %v1549_v3 = vpack.i.bf16 %v1852_v55, %v1849_v54  ;;  %v461_v6 = vmul.f32 %v1733_v57, %v1705_v47  ;;  %v464_v10 = vmul.f32 %v1733_v57, %v1711_v50  ;;  %v423_v12 = vmul.f32 %v409_v58, %v1689_v39 }
  0xaa   : > { %1385 = vrot.lane.b32.xlu0 %v1384_v17, %s1572_s19  ;;  %v414_v17 = vmul.f32 %v409_v58, %v1663_v24  ;;  %v482_v49 = vmul.f32 %v1740_v61, %v1705_v47  ;;  %v445_v47 = vmul.f32 %v1707_v48, %v1713_v51 }
  0xab   : > { %1360 = vrot.lane.b32.xlu1 %v1339_v62, %s1570_s17 }
  0xae   : > { %1395 = vrot.lane.b32.xlu0 %v1394_v25, %s1573_s20  ;;  %v415_v25 = vmul.f32 %v1698_v43, %v1692_v40 }
  0xaf   : > { %1365 = vrot.lane.b32.xlu1 %v1755_v4, %s1570_s17  ;;  %s279_s17 = scalar_lea.vmem %s2192_s5, %s1636_s23  ;;  %s1214_s23 = sshll.u32 %s2195_s22, 4 }
  0xb0   : > { %v1424_v44 = vpack.i.bf16 %v415_v25, %v414_v17  ;;  %v435_v25 = vmul.f32 %v430_v60, %v1663_v24 }
  0xb2   : > { %1405 = vrot.lane.b32.xlu0 %v1404_v5, %s1574_s24  ;;  %v1399_v5 = vpack.i.bf16 %v443_v28, %v440_v30  ;;  %v436_v30 = vmul.f32 %v1707_v48, %v1692_v40  ;;  %v417_v28 = vmul.f32 %v409_v58, %v1659_v23 }
  0xb3   : > { %1380 = vrot.lane.b32.xlu1 %v1339_v62, %s1571_s18  ;;  %v424_v62 = vmul.f32 %v1698_v43, %v1713_v51 }
  0xb5   : > { %v1439_v17 = vpack.i.bf16 %v424_v62, %v423_v12  ;;  %v421_v12 = vmul.f32 %v1698_v43, %v1744_v63 }
  0xb6   : > { %1415 = vrot.lane.b32.xlu0 %v1414_v26, %s1575_s25  ;;  %v485_v26 = vmul.f32 %v1740_v61, %v1711_v50 }
  0xb7   : > { %1390 = vrot.lane.b32.xlu1 %v1389_v29, %s1572_s19  ;;  %v1409_v29 = vpack.i.bf16 %v464_v10, %v461_v6  ;;  %v444_v6 = vmul.f32 %v430_v60, %v1689_v39  ;;  %v420_v10 = vmul.f32 %v409_v58, %v1674_v32 }
  0xb8   : > { %v1419_v62 = vpack.i.bf16 %v485_v26, %v482_v49  ;;  %v451_v49 = vsel %vm450_vm7, %v1733_v57, %v1731_v56  ;;  %v442_v26 = vmul.f32 %v1707_v48, %v1744_v63 }
  0xb9   : > { %v1459_v61 = vpack.i.bf16 %v445_v47, %v444_v6 }
  0xba   : > { %1425 = vrot.lane.b32.xlu0 %v1424_v44, %s1572_s19  ;;  %v418_v44 = vmul.f32 %v1698_v43, %v1735_v59  ;;  %v441_v43 = vmul.f32 %v430_v60, %v1674_v32 }
  0xbb   : > { %1400 = vrot.lane.b32.xlu1 %v1399_v5, %s1573_s20  ;;  %v1444_v5 = vpack.i.bf16 %v436_v30, %v435_v25  ;;  %v438_v25 = vmul.f32 %v430_v60, %v1659_v23  ;;  %v456_v30 = vmul.f32 %v451_v49, %v1663_v24  ;;  %v466_v60 = vmul.f32 %v1731_v56, %v1713_v51 }
  0xbc   : > { %v1429_v50 = vpack.i.bf16 %v418_v44, %v417_v28  ;;  %v457_v28 = vmul.f32 %v1731_v56, %v1692_v40  ;;  %v1454_v57 = vpack.i.bf16 %v442_v26, %v441_v43  ;;  %v459_v40 = vmul.f32 %v451_v49, %v1659_v23 }
  0xbd   : > { %v462_v51 = vmul.f32 %v451_v49, %v1674_v32 }
  0xbe   : > { %1440 = vrot.lane.b32.xlu0 %v1439_v17, %s1572_s19  ;;  %v1434_v17 = vpack.i.bf16 %v421_v12, %v420_v10  ;;  %v1484_v44 = vpack.i.bf16 %v457_v28, %v456_v30 }
  0xbf   : > { %1410 = vrot.lane.b32.xlu1 %v1409_v29, %s1574_s24  ;;  %v439_v29 = vmul.f32 %v1707_v48, %v1735_v59 }
  0xc1   : > { %v1449_v58 = vpack.i.bf16 %v439_v29, %v438_v25 }
  0xc2   : > { %1445 = vrot.lane.b32.xlu0 %v1444_v5, %s1573_s20 }
  0xc3   : > { %1420 = vrot.lane.b32.xlu1 %v1419_v62, %s1575_s25 }
  0xc6   : > { %1460 = vrot.lane.b32.xlu0 %v1459_v61, %s1573_s20 }
  0xc7   : > { %1430 = vrot.lane.b32.xlu1 %v1429_v50, %s1572_s19 }
  0xca   : > { %1465 = vrot.lane.b32.xlu0 %v1679_v33, %s1571_s18  ;;  %v465_v33 = vmul.f32 %v451_v49, %v1689_v39  ;;  %v460_v39 = vmul.f32 %v1731_v56, %v1735_v59  ;;  %v505_v59 = vmul.f32 %v1751_v2, %v1744_v63 }
  0xcb   : > { %1435 = vrot.lane.b32.xlu1 %v1434_v17, %s1572_s19 }
  0xcc   : > { %v1499_v24 = vpack.i.bf16 %v466_v60, %v465_v33  ;;  %v1489_v48 = vpack.i.bf16 %v460_v39, %v459_v40 }
  0xce   : > { %1475 = vrot.lane.b32.xlu0 %v1755_v4, %s1571_s18  ;;  %v463_v4 = vmul.f32 %v1731_v56, %v1744_v63 }
  0xcf   : > { %1450 = vrot.lane.b32.xlu1 %v1449_v58, %s1573_s20 }
  0xd0   : > { %v1494_v23 = vpack.i.bf16 %v463_v4, %v462_v51 }
  0xd2   : > { %1485 = vrot.lane.b32.xlu0 %v1484_v44, %s1574_s24 }
  0xd3   : > { %1455 = vrot.lane.b32.xlu1 %v1454_v57, %s1573_s20  ;;  %s284_s20 = scalar_lea.vmem %s2193_s6, %s1214_s23 }
  0xd6   : > { %1500 = vrot.lane.b32.xlu0 %v1499_v24, %s1574_s24 }
  0xd7   : > { %1470 = vrot.lane.b32.xlu1 %v1469_v13, %s1576_s26 }
  0xda   : > { %1505 = vrot.lane.b32.xlu0 %v1504_v18, %s1575_s25 }
  0xdb   : > { %1480 = vrot.lane.b32.xlu1 %v1721_v53, %s1571_s18  ;;  %v504_v53 = vmul.f32 %v1768_v9, %v1674_v32  ;;  %v359_v32 = vld [vmem:[%s2191_s4 + $0x8] sm:$0xff] }
  0xdc   : > { %979 = vmatprep.mubr.f32.mxu1 %v359_v32 }
  0xdd   : > { %v1534_v56 = vpack.i.bf16 %v505_v59, %v504_v53 }
  0xde   : > { %1520 = vrot.lane.b32.xlu0 %v1519_v20, %s1575_s25 }
  0xdf   : > { %1490 = vrot.lane.b32.xlu1 %v1489_v48, %s1574_s24 }
  0xe2   : > { %1525 = vrot.lane.b32.xlu0 %v1524_v31, %s1576_s26 }
  0xe3   : > { %1495 = vrot.lane.b32.xlu1 %v1494_v23, %s1574_s24 }
  0xe6   : > { %1535 = vrot.lane.b32.xlu0 %v1534_v56, %s1576_s26 }
  0xe7   : > { %1510 = vrot.lane.b32.xlu1 %v1509_v36, %s1575_s25 }
  0xea   : > { %1540 = vrot.lane.b32.xlu0 %v1717_v52, %s1571_s18 }
  0xeb   : > { %1515 = vrot.lane.b32.xlu1 %v1514_v41, %s1575_s25 }
  0xef   : > { %1530 = vrot.lane.b32.xlu1 %v1529_v46, %s1576_s26 }
  0xf3   : > { %1545 = vrot.lane.b32.xlu1 %v1544_v1, %s1576_s26 }
  0xf7   : > { %1550 = vrot.lane.b32.xlu1 %v1549_v3, %s1576_s26 }
 0x100   : > { %v1316_v63 = vpop.permute.xlu0 %1315 }
 0x101   : > { %v1317_v15 = vunpack.i.l.bf16 %v1316_v63  ;;  %v1318_v19 = vunpack.i.h.bf16 %v1316_v63 }
 0x104   : > { %v1986_v2 = vpop.permute.xlu0 %1325 }
 0x108   : > { %v1336_v52 = vpop.permute.xlu0 %1335 }
 0x109   : > { %v1338_v13 = vunpack.i.h.bf16 %v1336_v52  ;;  %v1337_v14 = vunpack.i.l.bf16 %v1336_v52 }
 0x10b   : > { %v547_v27 = vsel %vm545_vm8, %v1337_v14, %v1338_v13  ;;  %v546_v31 = vsel %vm545_vm8, %v1317_v15, %v1337_v14 }
 0x10c   : > { %v1351_v8 = vpop.permute.xlu0 %1350 }
 0x10d   : > { %v1321_v7 = vpop.permute.xlu1 %1320  ;;  %v1353_v34 = vunpack.i.h.bf16 %v1351_v8  ;;  %v1352_v35 = vunpack.i.l.bf16 %v1351_v8 }
 0x10e   : > { %v1323_v22 = vunpack.i.h.bf16 %v1321_v7  ;;  %v1322_v46 = vunpack.i.l.bf16 %v1321_v7 }
 0x10f   : > { %v553_v3 = vsel %vm545_vm8, %v1352_v35, %v1353_v34 }
 0x110   : > { %v1990_v11 = vpop.permute.xlu0 %1355  ;;  %v552_v5 = vsel %vm545_vm8, %v1323_v22, %v1352_v35 }
 0x111   : > { %v1988_v9 = vpop.permute.xlu1 %1330 }
 0x114   : > { %v1992_v18 = vpop.permute.xlu0 %1370 }
 0x115   : > { %v1341_v16 = vpop.permute.xlu1 %1340 }
 0x116   : > { %v1343_v20 = vunpack.i.h.bf16 %v1341_v16  ;;  %v1342_v21 = vunpack.i.l.bf16 %v1341_v16 }
 0x118   : > { %v549_v36 = vsel %vm545_vm8, %v1342_v21, %v1343_v20  ;;  %v548_v37 = vsel %vm545_vm8, %v1318_v19, %v1342_v21  ;;  %v1998_v41 = vpop.permute.xlu0 %1375 }
 0x119   : > { %v1346_v38 = vpop.permute.xlu1 %1345  ;;  %v1223_v42 = vpack.c.bf16 %v549_v36, %v547_v27  ;;  %v1225_v45 = vpack.c.bf16 %v548_v37, %v546_v31 }
 0x11a   : > { %v1348_v54 = vunpack.i.h.bf16 %v1346_v38  ;;  %v1347_v55 = vunpack.i.l.bf16 %v1346_v38 }
 0x11b   : > { %1224 = vmatprep.subr.bf16.mxu1 %v1223_v42 }
 0x11c   : > { %1226 = vmatpush1.bf16.msra.mxu1 %v1225_v45  ;;  %v551_v1 = vsel %vm545_vm8, %v1347_v55, %v1348_v54  ;;  %v550_v62 = vsel %vm545_vm8, %v1322_v46, %v1347_v55  ;;  %v1386_v47 = vpop.permute.xlu0 %1385 }
 0x11d   : > { %v2004_v6 = vpop.permute.xlu1 %1360  ;;  %v1227_v50 = vpack.c.bf16 %v553_v3, %v551_v1  ;;  %v1229_v61 = vpack.c.bf16 %v552_v5, %v550_v62  ;;  %v1387_v60 = vunpack.i.l.bf16 %v1386_v47  ;;  %v1388_v39 = vunpack.i.h.bf16 %v1386_v47 }
 0x11e   : > { %v1363_v54 = vunpack.i.h.bf16 %v2004_v6  ;;  %v1362_v55 = vunpack.i.l.bf16 %v2004_v6 }
 0x11f   : > { %1228 = vmatprep.subr.bf16.mxu1 %v1227_v50 }
 0x120   : > { %1230 = vmatpush1.bf16.msra.mxu1 %v1229_v61  ;;  %v2008_v12 = vpop.permute.xlu0 %1395  ;;  %v1358_v61 = vunpack.i.h.bf16 %v1990_v11 }
 0x121   : > { %v2006_v10 = vpop.permute.xlu1 %1365  ;;  %v1397_v34 = vunpack.i.l.bf16 %v2008_v12  ;;  %v1398_v42 = vunpack.i.h.bf16 %v2008_v12  ;;  %v1357_v12 = vunpack.i.l.bf16 %v1990_v11 }
 0x124   : > { %v2012_v25 = vpop.permute.xlu0 %1405 }
 0x125   : > { %v2010_v17 = vpop.permute.xlu1 %1380 }
 0x128   : > { %v2014_v49 = vpop.permute.xlu0 %1415 }
 0x129   : > { %v1391_v29 = vpop.permute.xlu1 %1390 }
 0x12a   : > { %v1393_v13 = vunpack.i.h.bf16 %v1391_v29  ;;  %v1392_v14 = vunpack.i.l.bf16 %v1391_v29 }
 0x12c   : > { %v1426_v58 = vpop.permute.xlu0 %1425 }
 0x12d   : > { %v2016_v43 = vpop.permute.xlu1 %1400  ;;  %v1428_v44 = vunpack.i.h.bf16 %v1426_v58  ;;  %v1427_v33 = vunpack.i.l.bf16 %v1426_v58 }
 0x12f   : > { %v600_v4 = vsel %vm598_vm9, %v1427_v33, %v1428_v44  ;;  %v599_v23 = vsel %vm598_vm9, %v1387_v60, %v1427_v33  ;;  %v1402_v44 = vunpack.i.l.bf16 %v2016_v43 }
 0x130   : > { %v1441_v30 = vpop.permute.xlu0 %1440 }
 0x131   : > { %v2018_v26 = vpop.permute.xlu1 %1410  ;;  %v1443_v53 = vunpack.i.h.bf16 %v1441_v30  ;;  %v1442_v59 = vunpack.i.l.bf16 %v1441_v30 }
 0x133   : > { %v606_v22 = vsel %vm598_vm9, %v1442_v59, %v1443_v53  ;;  %v605_v31 = vsel %vm598_vm9, %v1393_v13, %v1442_v59 }
 0x134   : > { %v1446_v57 = vpop.permute.xlu0 %1445 }
 0x135   : > { %v2020_v28 = vpop.permute.xlu1 %1420  ;;  %v1448_v19 = vunpack.i.h.bf16 %v1446_v57  ;;  %v1447_v20 = vunpack.i.l.bf16 %v1446_v57  ;;  %v1403_v57 = vunpack.i.h.bf16 %v2016_v43  ;;  %v1328_v43 = vunpack.i.h.bf16 %v1986_v2 }
 0x137   : > { %v653_v1 = vsel %vm651_vm10, %v1447_v20, %v1448_v19  ;;  %v652_v3 = vsel %vm651_vm10, %v1397_v34, %v1447_v20  ;;  %v695_v13 = vsel %vm692_vm11, %v1328_v43, %v1362_v55  ;;  %v1333_v20 = vunpack.i.h.bf16 %v1988_v9 }
 0x138   : > { %v2022_v40 = vpop.permute.xlu0 %1460 }
 0x139   : > { %v1431_v24 = vpop.permute.xlu1 %1430  ;;  %v1463_v62 = vunpack.i.h.bf16 %v2022_v40  ;;  %v1462_v5 = vunpack.i.l.bf16 %v2022_v40  ;;  %v1367_v40 = vunpack.i.l.bf16 %v2006_v10 }
 0x13a   : > { %v1433_v48 = vunpack.i.h.bf16 %v1431_v24  ;;  %v1432_v51 = vunpack.i.l.bf16 %v1431_v24  ;;  %v1368_v24 = vunpack.i.h.bf16 %v2006_v10 }
 0x13c   : > { %v602_v56 = vsel %vm598_vm9, %v1432_v51, %v1433_v48  ;;  %v601_v32 = vsel %vm598_vm9, %v1388_v39, %v1432_v51  ;;  %v2028_v52 = vpop.permute.xlu0 %1465  ;;  %v696_v39 = vsel %vm692_vm11, %v1362_v55, %v1363_v54  ;;  %v659_v48 = vsel %vm651_vm10, %v1462_v5, %v1463_v62 }
 0x13d   : > { %v1436_v63 = vpop.permute.xlu1 %1435  ;;  %v1231_v7 = vpack.c.bf16 %v602_v56, %v600_v4  ;;  %v1233_v8 = vpack.c.bf16 %v601_v32, %v599_v23  ;;  %v658_v4 = vsel %vm651_vm10, %v1403_v57, %v1462_v5  ;;  %v1373_v56 = vunpack.i.h.bf16 %v1992_v18 }
 0x13e   : > { %v1438_v15 = vunpack.i.h.bf16 %v1436_v63  ;;  %v1437_v16 = vunpack.i.l.bf16 %v1436_v63  ;;  %v1372_v32 = vunpack.i.l.bf16 %v1992_v18  ;;  %v694_v63 = vsel %vm692_vm11, %v1357_v12, %v1358_v61 }
 0x13f   : > { %1232 = vmatprep.subr.bf16.mxu1 %v1231_v7  ;;  %v1327_v7 = vunpack.i.l.bf16 %v1986_v2  ;;  %v1382_v62 = vunpack.i.l.bf16 %v2010_v17  ;;  %v1412_v57 = vunpack.i.l.bf16 %v2018_v26  ;;  %v1467_v43 = vunpack.i.l.bf16 %v2028_v52 }
 0x140   : > { %1234 = vmatpush1.bf16.msra.mxu1 %v1233_v8  ;;  %v604_v21 = vsel %vm598_vm9, %v1437_v16, %v1438_v15  ;;  %v603_v27 = vsel %vm598_vm9, %v1392_v14, %v1437_v16  ;;  %v2035_v36 = vpop.permute.xlu0 %1475  ;;  %v1247_v8 = vpack.c.bf16 %v696_v39, %v694_v63  ;;  %v698_v14 = vsel %vm692_vm11, %v1367_v40, %v1368_v24 }
 0x141   : > { %v1451_v35 = vpop.permute.xlu1 %1450  ;;  %v1235_v37 = vpack.c.bf16 %v606_v22, %v604_v21  ;;  %v1237_v38 = vpack.c.bf16 %v605_v31, %v603_v27  ;;  %v1332_v15 = vunpack.i.l.bf16 %v1988_v9  ;;  %v693_v18 = vsel %vm692_vm11, %v1327_v7, %v1357_v12 }
 0x142   : > { %v1453_v45 = vunpack.i.h.bf16 %v1451_v35  ;;  %v1452_v46 = vunpack.i.l.bf16 %v1451_v35  ;;  %v1249_v21 = vpack.c.bf16 %v695_v13, %v693_v18  ;;  %v700_v2 = vsel %vm692_vm11, %v1372_v32, %v1373_v56 }
 0x143   : > { %1236 = vmatprep.subr.bf16.mxu1 %v1235_v37  ;;  %v1251_v31 = vpack.c.bf16 %v700_v2, %v698_v14  ;;  %v697_v34 = vsel %vm692_vm11, %v1332_v15, %v1367_v40  ;;  %v1378_v35 = vunpack.i.h.bf16 %v1998_v41  ;;  %v1377_v37 = vunpack.i.l.bf16 %v1998_v41 }
 0x144   : > { %1238 = vmatpush1.bf16.msra.mxu1 %v1237_v38  ;;  %v655_v47 = vsel %vm651_vm10, %v1452_v46, %v1453_v45  ;;  %v654_v50 = vsel %vm651_vm10, %v1398_v42, %v1452_v46  ;;  %v1486_v6 = vpop.permute.xlu0 %1485  ;;  %v1407_v38 = vunpack.i.l.bf16 %v2012_v25  ;;  %v699_v45 = vsel %vm692_vm11, %v1333_v20, %v1372_v32 }
 0x145   : > { %v1456_v29 = vpop.permute.xlu1 %1455  ;;  %v1239_v58 = vpack.c.bf16 %v655_v47, %v653_v1  ;;  %v1241_v30 = vpack.c.bf16 %v654_v50, %v652_v3  ;;  %v1488_v22 = vunpack.i.h.bf16 %v1486_v6  ;;  %v1487_v27 = vunpack.i.l.bf16 %v1486_v6 }
 0x146   : > { %v1458_v33 = vunpack.i.h.bf16 %v1456_v29  ;;  %v1457_v60 = vunpack.i.l.bf16 %v1456_v29  ;;  %v1408_v46 = vunpack.i.h.bf16 %v2012_v25  ;;  %v1253_v1 = vpack.c.bf16 %v699_v45, %v697_v34 }
 0x147   : > { %1240 = vmatprep.subr.bf16.mxu1 %v1239_v58  ;;  %v1383_v3 = vunpack.i.h.bf16 %v2010_v17  ;;  %v747_v5 = vsel %vm745_vm12, %v1487_v27, %v1488_v22  ;;  %v746_v47 = vsel %vm745_vm12, %v1407_v38, %v1487_v27  ;;  %v1413_v17 = vunpack.i.h.bf16 %v2018_v26 }
 0x148   : > { %1242 = vmatpush1.bf16.msra.mxu1 %v1241_v30  ;;  %v657_v11 = vsel %vm651_vm10, %v1457_v60, %v1458_v33  ;;  %v656_v51 = vsel %vm651_vm10, %v1402_v44, %v1457_v60  ;;  %v2060_v53 = vpop.permute.xlu0 %1500  ;;  %v2101_v40 = vsel %vm839_vm13, %v1377_v37, %v1378_v35  ;;  %v1418_v56 = vunpack.i.h.bf16 %v2014_v49 }
 0x149   : > { %v2058_v23 = vpop.permute.xlu1 %1470  ;;  %v1243_v59 = vpack.c.bf16 %v659_v48, %v657_v11  ;;  %v1245_v10 = vpack.c.bf16 %v658_v4, %v656_v51  ;;  %v1503_v50 = vunpack.i.h.bf16 %v2060_v53  ;;  %v1502_v61 = vunpack.i.l.bf16 %v2060_v53 }
 0x14a   : > { %v2104_v39 = vsel %vm839_vm13, %v1382_v62, %v1383_v3  ;;  %v1417_v4 = vunpack.i.l.bf16 %v2014_v49  ;;  %v1423_v13 = vunpack.i.h.bf16 %v2020_v28  ;;  %v1468_v14 = vunpack.i.h.bf16 %v2028_v52 }
 0x14b   : > { %1244 = vmatprep.subr.bf16.mxu1 %v1243_v59  ;;  %v753_v26 = vsel %vm745_vm12, %v1502_v61, %v1503_v50  ;;  %v752_v51 = vsel %vm745_vm12, %v1413_v17, %v1502_v61  ;;  %v1422_v2 = vunpack.i.l.bf16 %v2020_v28  ;;  %v840_v52 = vsel %vm839_vm13, %v1467_v43, %v1377_v37 }
 0x14c   : > { %1246 = vmatpush1.bf16.msra.mxu1 %v1245_v10  ;;  %v2071_v19 = vpop.permute.xlu0 %1505  ;;  %v842_v28 = vsel %vm839_vm13, %v1468_v14, %v1382_v62  ;;  %v1472_v3 = vunpack.i.l.bf16 %v2058_v23  ;;  %v1473_v61 = vunpack.i.h.bf16 %v2058_v23  ;;  %v362_v14 = vld [vmem:[%s2191_s4 + $0x20] sm:$0xff] }
 0x14d   : > { %v2069_v16 = vpop.permute.xlu1 %1480  ;;  %1248 = vmatprep.subr.bf16.mxu1 %v1247_v8  ;;  %v1508_v60 = vunpack.i.h.bf16 %v2071_v19  ;;  %v1507_v24 = vunpack.i.l.bf16 %v2071_v19  ;;  %v1271_v8 = vpack.c.bf16 %v2104_v39, %v2101_v40  ;;  %v1273_v39 = vpack.c.bf16 %v842_v28, %v840_v52 }
 0x14e   : > { %v1483_v34 = vunpack.i.h.bf16 %v2069_v16  ;;  %v1482_v35 = vunpack.i.l.bf16 %v2069_v16 }
 0x14f   : > { %v800_v15 = vsel %vm798_vm14, %v1507_v24, %v1508_v60  ;;  %v799_v19 = vsel %vm798_vm14, %v1417_v4, %v1507_v24 }
 0x150   : > { %1250 = vmatpush1.bf16.msra.mxu1 %v1249_v21  ;;  %v2080_v9 = vpop.permute.xlu0 %1520 }
 0x151   : > { %v1491_v42 = vpop.permute.xlu1 %1490  ;;  %1252 = vmatprep.subr.bf16.mxu1 %v1251_v31  ;;  %v1523_v18 = vunpack.i.h.bf16 %v2080_v9  ;;  %v1522_v49 = vunpack.i.l.bf16 %v2080_v9  ;;  %v1478_v9 = vunpack.i.h.bf16 %v2035_v36 }
 0x152   : > { %v1493_v54 = vunpack.i.h.bf16 %v1491_v42  ;;  %v1492_v55 = vunpack.i.l.bf16 %v1491_v42 }
 0x153   : > { %v806_v37 = vsel %vm798_vm14, %v1522_v49, %v1523_v18  ;;  %v805_v16 = vsel %vm798_vm14, %v1423_v13, %v1522_v49  ;;  %v363_v18 = vld [vmem:[%s2191_s4 + $0x28] sm:$0xff] }
 0x154   : > { %1254 = vmatpush1.bf16.msra.mxu1 %v1253_v1  ;;  %v749_v12 = vsel %vm745_vm12, %v1492_v55, %v1493_v54  ;;  %v748_v25 = vsel %vm745_vm12, %v1408_v46, %v1492_v55  ;;  %v2092_v6 = vpop.permute.xlu0 %1525  ;;  %v1477_v1 = vunpack.i.l.bf16 %v2035_v36 }
 0x155   : > { %v1496_v29 = vpop.permute.xlu1 %1495  ;;  %v1255_v58 = vpack.c.bf16 %v749_v12, %v747_v5  ;;  %v1257_v30 = vpack.c.bf16 %v748_v25, %v746_v47  ;;  %v1528_v45 = vunpack.i.h.bf16 %v2092_v6  ;;  %v1527_v46 = vunpack.i.l.bf16 %v2092_v6 }
 0x156   : > { %v1498_v44 = vunpack.i.h.bf16 %v1496_v29  ;;  %v1497_v33 = vunpack.i.l.bf16 %v1496_v29  ;;  %v847_v25 = vsel %vm839_vm13, %v1482_v35, %v1483_v34 }
 0x157   : > { %1256 = vmatprep.subr.bf16.mxu1 %v1255_v58  ;;  %v894_v58 = vsel %vm892_vm15, %v1527_v46, %v1528_v45 }
 0x158   : > { %1258 = vmatpush1.bf16.msra.mxu1 %v1257_v30  ;;  %v751_v11 = vsel %vm745_vm12, %v1497_v33, %v1498_v44  ;;  %v750_v48 = vsel %vm745_vm12, %v1412_v57, %v1497_v33  ;;  %v2113_v7 = vpop.permute.xlu0 %1535  ;;  %v893_v30 = vsel %vm892_vm15, %v1472_v3, %v1527_v46 }
 0x159   : > { %v1511_v53 = vpop.permute.xlu1 %1510  ;;  %v1259_v59 = vpack.c.bf16 %v753_v26, %v751_v11  ;;  %v1261_v10 = vpack.c.bf16 %v752_v51, %v750_v48  ;;  %v1538_v36 = vunpack.i.h.bf16 %v2113_v7  ;;  %v1537_v17 = vunpack.i.l.bf16 %v2113_v7 }
 0x15a   : > { %v1513_v32 = vunpack.i.h.bf16 %v1511_v53  ;;  %v1512_v63 = vunpack.i.l.bf16 %v1511_v53  ;;  %v845_v11 = vsel %vm839_vm13, %v1477_v1, %v1478_v9 }
 0x15b   : > { %1260 = vmatprep.subr.bf16.mxu1 %v1259_v59  ;;  %v1275_v26 = vpack.c.bf16 %v847_v25, %v845_v11  ;;  %v898_v4 = vsel %vm892_vm15, %v1537_v17, %v1538_v36 }
 0x15c   : > { %1262 = vmatpush1.bf16.msra.mxu1 %v1261_v10  ;;  %v802_v20 = vsel %vm798_vm14, %v1512_v63, %v1513_v32  ;;  %v801_v21 = vsel %vm798_vm14, %v1418_v56, %v1512_v63  ;;  %v1541_v54 = vpop.permute.xlu0 %1540 }
 0x15d   : > { %v1516_v22 = vpop.permute.xlu1 %1515  ;;  %v1263_v27 = vpack.c.bf16 %v802_v20, %v800_v15  ;;  %v1265_v31 = vpack.c.bf16 %v801_v21, %v799_v19  ;;  %v1543_v29 = vunpack.i.h.bf16 %v1541_v54  ;;  %v1542_v6 = vunpack.i.l.bf16 %v1541_v54  ;;  %v360_v15 = vld [vmem:[%s2191_s4 + $0x10] sm:$0xff]  ;;  %v361_v19 = vld [vmem:[%s2191_s4 + $0x18] sm:$0xff] }
 0x15e   : > { %v1518_v38 = vunpack.i.h.bf16 %v1516_v22  ;;  %v1517_v42 = vunpack.i.l.bf16 %v1516_v22 }
 0x15f   : > { %1264 = vmatprep.subr.bf16.mxu1 %v1263_v27  ;;  %v844_v48 = vsel %vm839_vm13, %v1542_v6, %v1477_v1  ;;  %v846_v51 = vsel %vm839_vm13, %v1543_v29, %v1482_v35 }
 0x160   : > { %1266 = vmatpush1.bf16.msra.mxu1 %v1265_v31  ;;  %v804_v41 = vsel %vm798_vm14, %v1517_v42, %v1518_v38  ;;  %v803_v55 = vsel %vm798_vm14, %v1422_v2, %v1517_v42  ;;  %v1277_v32 = vpack.c.bf16 %v846_v51, %v844_v48 }
 0x161   : > { %v1531_v5 = vpop.permute.xlu1 %1530  ;;  %v1267_v47 = vpack.c.bf16 %v806_v37, %v804_v41  ;;  %v1269_v50 = vpack.c.bf16 %v805_v16, %v803_v55 }
 0x162   : > { %v1533_v62 = vunpack.i.h.bf16 %v1531_v5  ;;  %v1532_v12 = vunpack.i.l.bf16 %v1531_v5 }
 0x163   : > { %1268 = vmatprep.subr.bf16.mxu1 %v1267_v47 }
 0x164   : > { %1270 = vmatpush1.bf16.msra.mxu1 %v1269_v50  ;;  %v896_v57 = vsel %vm892_vm15, %v1532_v12, %v1533_v62  ;;  %v895_v23 = vsel %vm892_vm15, %v1473_v61, %v1532_v12 }
 0x165   : > { %v1546_v44 = vpop.permute.xlu1 %1545  ;;  %1272 = vmatprep.subr.bf16.mxu1 %v1271_v8  ;;  %v1279_v33 = vpack.c.bf16 %v896_v57, %v894_v58  ;;  %v1281_v60 = vpack.c.bf16 %v895_v23, %v893_v30  ;;  %v358_v8 = vld [vmem:[%s2191_s4] sm:$0xff] }
 0x166   : > { %v1548_v24 = vunpack.i.h.bf16 %v1546_v44  ;;  %v1547_v40 = vunpack.i.l.bf16 %v1546_v44 }
 0x167   : > { %1280 = vmatprep.subr.bf16.mxu0 %v1279_v33 }
 0x168   : > { %1274 = vmatpush1.bf16.msra.mxu1 %v1273_v39  ;;  %1282 = vmatpush1.bf16.msra.mxu0 %v1281_v60  ;;  %v900_v43 = vsel %vm892_vm15, %v1547_v40, %v1548_v24 }
 0x169   : > { %v1551_v53 = vpop.permute.xlu1 %1550  ;;  %1276 = vmatprep.subr.bf16.mxu1 %v1275_v26  ;;  %v1283_v59 = vpack.c.bf16 %v900_v43, %v898_v4 }
 0x16a   : > { %v1553_v10 = vunpack.i.h.bf16 %v1551_v53  ;;  %v1552_v56 = vunpack.i.l.bf16 %v1551_v53 }
 0x16b   : > { %1284 = vmatprep.subr.bf16.mxu0 %v1283_v59 }
 0x16c   : > { %1278 = vmatpush1.bf16.msra.mxu1 %v1277_v32  ;;  %v897_v63 = vsel %vm892_vm15, %v1552_v56, %v1537_v17  ;;  %v899_v7 = vsel %vm892_vm15, %v1553_v10, %v1547_v40 }
 0x16d   : > { %v1285_v13 = vpack.c.bf16 %v899_v7, %v897_v63 }
 0x16f   : > { %1286 = vmatpush1.bf16.msra.mxu0 %v1285_v13  ;;  %980 = vmatmul.mubr.f32.vlgmr.msra.gmra.mrb[0].mxu1 %v358_v8 }
 0x170   : > { %985 = vmatprep.mubr.f32.mxu1 %v362_v14 }
 0x172   : > { %1207 = vmatmul.mubr.msk.f32.vlgmr.msra.gmra.mrb[0].mxu0 %vm471_vm3, %v360_v15 }
 0x173   : > { %1062 = vmatprep.mubr.f32.mxu0 %v1562_v0  ;;  %986 = vmatmul.mubr.f32.gmra.mrb[2].mxu1 %v361_v19 }
 0x176   : > { %1208 = vmatmul.mubr.msk.f32.gmra.mrb[2].mxu0 %vm471_vm3, %v363_v18 }
 0x242   : > { %v981_v49 = vpop.f32.mrb[0].mxu1 }
 0x243   : > { %v983_v20 = vpop.f32.mrb[1].mxu1 }
 0x245   : > { %v1058_v21 = vpop.f32.mrb[0].mxu0 }
 0x246   : > { %v1059_v2 = vadd.f32 %v1058_v21, %v981_v49  ;;  %v1060_v22 = vpop.f32.mrb[1].mxu0  ;;  %v987_v27 = vpop.f32.mrb[2].mxu1 }
 0x247   : > { %v1061_v31 = vadd.f32 %v1060_v22, %v983_v20  ;;  %v989_v52 = vpop.f32.mrb[3].mxu1 }
 0x248   : > { %1069 = vst [vmem:[%s279_s17] sm:$0xff] %v1059_v2  ;;  %v1079_v0 = vmul.f32 %v1059_v2, %v1059_v2 }
 0x249   : > { %1070 = vst [vmem:[%s279_s17 + $0x8] sm:$0xff] %v1061_v31  ;;  %v1064_v34 = vpop.f32.mrb[2].mxu0  ;;  %v1073_v35 = vadd.f32 %v1061_v31, %v1059_v2  ;;  %v1080_v38 = vmul.f32 %v1061_v31, %v1061_v31 }
 0x24a   : > { %v1065_v42 = vadd.f32 %v1064_v34, %v987_v27  ;;  %v1066_v9 = vpop.f32.mrb[3].mxu0 }
 0x24b   : > { %1074 = vadd.xlane.f32.xlu0 %v1073_v35  ;;  %v1067_v45 = vadd.f32 %v1066_v9, %v989_v52  ;;  %v1083_v46 = vadd.f32 %v1080_v38, %v1079_v0 }
 0x24c   : > { %1071 = vst [vmem:[%s279_s17 + $0x10] sm:$0xff] %v1065_v42  ;;  %v1081_v28 = vmul.f32 %v1065_v42, %v1065_v42 }
 0x24d   : > { %1072 = vst [vmem:[%s279_s17 + $0x18] sm:$0xff] %v1067_v45  ;;  %v1076_v54 = vadd.f32 %v1067_v45, %v1065_v42  ;;  %v1082_v41 = vmul.f32 %v1067_v45, %v1067_v45 }
 0x24f   : > { %1084 = vadd.xlane.f32.xlu0 %v1083_v46  ;;  %1077 = vadd.xlane.f32.xlu1 %v1076_v54  ;;  %v1086_v37 = vadd.f32 %v1082_v41, %v1081_v28 }
 0x253   : > { %1087 = vadd.xlane.f32.xlu0 %v1086_v37 }
 0x2d8   : > { %v1075_v55 = vpop.xlane.xlu0 %1074 }
 0x2dc   : > { %v1085_v16 = vpop.xlane.xlu0 %1084  ;;  %v1078_v3 = vpop.xlane.xlu1 %1077 }
 0x2dd   : > { %v1090_v1 = vsel %vm1089_vm0, %v1075_v55, %v1085_v16 }
 0x2de   : > { %1092 = vst.msk [vmem:[%s284_s20] sm:$0xff] %vm408_vm5, %v1090_v1 }
 0x2e0   : > { %v1088_v5 = vpop.xlane.xlu0 %1087 }
 0x2e1   : > { %v1091_v47 = vsel %vm1089_vm0, %v1078_v3, %v1088_v5 }
 0x2e2   : > { %1093 = vst.msk [vmem:[%s284_s20 + $0x8] sm:$0xff] %vm408_vm5, %v1091_v47 }
 0x2e3 PF: > { %s17_s21 = sadd.s32 1, %s1560_s21  }
 0x2e4   : > { %p14_p4 = scmp.ge.s32.totalorder %s17_s21, 4  }
 0x2e6   :  { %16 = sbr.rel (!%p14_p4) target bundleno = 1 (0x1), region = 85 }

// kernel: decoder_block_forward.6
= control target key start
LH: loop header
LB: loop body
LE: loop exit
PB: predicated region body
PF: predicated region fallthrough
CT: control target
= control target key end

     0   :  { %s1158_s24 = smov 0   ;;  %s1337_s0 = inlined_call_operand.vmem [shape: f32[2,16,256], index: 0, kind: input, shape index: {}]   ;;  %s1338_s1 = inlined_call_operand.vmem [shape: f32[16,1], index: 1, kind: input, shape index: {}]   ;;  %s1339_s2 = inlined_call_operand.vmem [shape: f32[16,1], index: 2, kind: input, shape index: {}]   ;;  %s1340_s3 = inlined_call_operand.vmem [shape: f32[1,256], index: 3, kind: input, shape index: {}]   ;;  %s1341_s4 = inlined_call_operand.vmem [shape: f32[1,256], index: 4, kind: input, shape index: {}]   ;;  %s1342_s5 = inlined_call_operand.vmem [shape: f32[16,144], index: 5, kind: input, shape index: {}]   ;;  %s1343_s6 = inlined_call_operand.vmem [shape: f32[2,16,256], index: 6, kind: output, shape index: {0}]   ;;  %s1344_s7 = inlined_call_operand.vmem [shape: f32[2,16,2], index: 7, kind: output, shape index: {1}]  }
   0x1 LB: > { %s876_s25 = sadd.s32 4294967295, %s1100_s24   ;;  %p880_p0 = scmp.ge.s32.totalorder %s1100_s24, 1  ;;  %s1100_s24 = sphi %s1158_s24, %s18_s24  }
   0x2   : > { %p240_p1 = scmp.lt.s32.totalorder %s1100_s24, 3 }
   0x4   : > { %p241_p2 = pnand %p880_p0, %p240_p1 }
   0x5   : > { %v312_v0 = vld [vmem:[%s1339_s2] sm:$0xff] (!%p241_p2)  ;;  %v1102_v2 = vmov (!%p241_p2), 0   ;;  %v313_v3 = vld [vmem:[%s1339_s2 + $0x8] sm:$0xff] (!%p241_p2)  ;;  %vm332_vm0 = vcmask (!%p241_p2), 138240   ;;  %vm335_vm1 = vcmask (!%p241_p2), 277640   ;;  %v1103_v5 = vmov (!%p241_p2), 0.0  }
   0x6   : > { %244 = sbr.rel (%p241_p2) target bundleno = 806 (0x326), region = 44  ;;  %v296_v1 = vld [vmem:[%s1338_s1] sm:$0xff] (!%p241_p2)  ;;  %973 = vset.pattern.permute.xlu1 (!%p241_p2), %v1102_v2  ;;  %972 = vset.pattern.permute.xlu0 (!%p241_p2), %v1102_v2  ;;  %v297_v4 = vld [vmem:[%s1338_s1 + $0x8] sm:$0xff] (!%p241_p2)  ;;  %336 = vst.msk [vmem:[#allocation2 + $0x10] sm:$0xff] (!%p241_p2), %vm335_vm1, %v1103_v5  ;;  %337 = vst.msk [vmem:[#allocation2 + $0x28] sm:$0xff] (!%p241_p2), %vm335_vm1, %v1103_v5  ;;  %p277_p3 = scmp.lt.s32.totalorder (!%p241_p2), %s876_s25, 1  ;;  %v376_v8 = vlaneseq (!%p241_p2) }
   0x7   : > { %316 = vperm.xlu1 (!%p241_p2), %973, %v312_v0   ;;  %300 = vperm.xlu0 (!%p241_p2), %972, %v296_v1   ;;  %333 = vst.msk [vmem:[#allocation2] sm:$0xff] (!%p241_p2), %vm332_vm0, %v1103_v5  ;;  %334 = vst.msk [vmem:[#allocation2 + $0x18] sm:$0xff] (!%p241_p2), %vm332_vm0, %v1103_v5  ;;  %s1104_s15 = smov (!%p241_p2), 17   ;;  %v366_v28 = vld [vmem:[%s1341_s4] sm:$0x3] (!%p241_p2)  ;;  %s1105_s20 = smov (!%p241_p2), 2  }
   0x8   : > { %v377_v17 = vshrl.u32 (!%p241_p2), %v376_v8, 7  ;;  %v365_v33 = vld [vmem:[%s1340_s3] sm:$0x3] (!%p241_p2)  ;;  %s1106_s21 = smov (!%p241_p2), 16   ;;  %s1107_s22 = smov (!%p241_p2), 18   ;;  %vm358_vm2 = vcmask (!%p241_p2), 1047688  }
   0x9   : > { %s1108_s23 = smov (!%p241_p2), 32   ;;  %s1109_s26 = smov (!%p241_p2), 34   ;;  %vm405_vm3 = vcmask (!%p241_p2), 15360   ;;  %vm420_vm4 = vcmask (!%p241_p2), 130048   ;;  %vm435_vm5 = vcmask (!%p241_p2), 146432   ;;  %vm450_vm6 = vcmask (!%p241_p2), 261120  }
   0xa   : > { %v382_v26 = vsub.s32 (!%p241_p2), 1, %v377_v17  ;;  %v378_v27 = vsub.s32 (!%p241_p2), 0, %v377_v17  ;;  %s1110_s27 = smov (!%p241_p2), 111   ;;  %s1111_s28 = smov (!%p241_p2), 127   ;;  %vm465_vm7 = vcmask (!%p241_p2), 277504   ;;  %vm494_vm8 = vcmask (!%p241_p2), 1039360  }
   0xb   : > { %321 = vperm.xlu1 (!%p241_p2), %973, %v313_v3   ;;  %305 = vperm.xlu0 (!%p241_p2), %972, %v297_v4   ;;  %s1112_s29 = smov (!%p241_p2), 126   ;;  %s1113_s30 = smov (!%p241_p2), 112   ;;  %vm569_vm9 = vcmask (!%p241_p2), 908288   ;;  %vm521_vm10 = vcmask (!%p241_p2), 1031168   ;;  %vm548_vm11 = vcmask (!%p241_p2), 916480   ;;  %vm596_vm12 = vcmask (!%p241_p2), 900096  }
   0xc   : > { %v400_v31 = vrot.slane (!%p241_p2), %v366_v28, %v382_v26  ;;  %v396_v32 = vrot.slane (!%p241_p2), %v366_v28, %v378_v27  ;;  %v383_v34 = vrot.slane (!%p241_p2), %v365_v33, %v382_v26  ;;  %v379_v35 = vrot.slane (!%p241_p2), %v365_v33, %v378_v27  ;;  %s1114_s8 = smov (!%p241_p2), 110   ;;  %s1115_s9 = smov (!%p241_p2), 96  }
   0xd   : > { %s1346_s25 = smov (!%p277_p3, %s876_s25), 1  ;;  %s1116_s10 = smov 95   ;;  %vm623_vm13 = vcmask 785408   ;;  %vm644_vm14 = vcmask 777216   ;;  %vm671_vm15 = vcmask 769024  }
   0xe   : > { %s891_s11 = sshll.u32 %s1346_s25, 5 }
   0xf   : > { %s281_s14 = scalar_lea.vmem %s1337_s0, %s891_s11 }
  0x10   : > { %v292_v6 = vld [vmem:[%s281_s14] sm:$0xff]  ;;  %v293_v7 = vld [vmem:[%s281_s14 + $0x8] sm:$0xff]  ;;  %v294_v13 = vld [vmem:[%s281_s14 + $0x10] sm:$0xff] }
  0x11   : > { %v295_v14 = vld [vmem:[%s281_s14 + $0x18] sm:$0xff]  ;;  %s1117_s14 = smov 94  }
  0x86   : > { %v317_v9 = vpop.permute.xlu1 %316  ;;  %v301_v10 = vpop.permute.xlu0 %300 }
  0x87   : > { %v308_v11 = vmul.f32 %v301_v10, %v292_v6  ;;  %v309_v12 = vmul.f32 %v301_v10, %v293_v7 }
  0x89   : > { %v324_v15 = vadd.f32 %v317_v9, %v308_v11  ;;  %v325_v16 = vadd.f32 %v317_v9, %v309_v12 }
  0x8a   : > { %v306_v18 = vpop.permute.xlu0 %305  ;;  %v322_v23 = vpop.permute.xlu1 %321 }
  0x8b   : > { %v310_v19 = vmul.f32 %v306_v18, %v294_v13  ;;  %v311_v20 = vmul.f32 %v306_v18, %v295_v14  ;;  %v329_v21 = vmax.f32 %v325_v16, 0.0  ;;  %v328_v22 = vmax.f32 %v324_v15, 0.0 }
  0x8d   : > { %v326_v24 = vadd.f32 %v322_v23, %v310_v19  ;;  %v327_v25 = vadd.f32 %v322_v23, %v311_v20  ;;  %344 = vrot.lane.b32.xlu1 %v329_v21, %s1104_s15  ;;  %342 = vrot.lane.b32.xlu0 %v328_v22, %s1104_s15 }
  0x8f   : > { %v331_v29 = vmax.f32 %v327_v25, 0.0  ;;  %v330_v30 = vmax.f32 %v326_v24, 0.0 }
  0x91   : > { %348 = vrot.lane.b32.xlu1 %v331_v29, %s1104_s15  ;;  %346 = vrot.lane.b32.xlu0 %v330_v30, %s1104_s15 }
  0x95   : > { %403 = vrot.lane.b32.xlu1 %v400_v31, %s1105_s20  ;;  %401 = vrot.lane.b32.xlu0 %v396_v32, %s1105_s20 }
  0x99   : > { %418 = vrot.lane.b32.xlu1 %v383_v34, %s1106_s21  ;;  %416 = vrot.lane.b32.xlu0 %v379_v35, %s1106_s21 }
  0x9d   : > { %433 = vrot.lane.b32.xlu1 %v400_v31, %s1107_s22  ;;  %431 = vrot.lane.b32.xlu0 %v396_v32, %s1107_s22 }
  0xa1   : > { %448 = vrot.lane.b32.xlu1 %v383_v34, %s1108_s23  ;;  %446 = vrot.lane.b32.xlu0 %v379_v35, %s1108_s23  ;;  %s286_s23 = scalar_lea.vmem %s1343_s6, %s891_s11  ;;  %s893_s11 = sshll.u32 %s1346_s25, 4 }
  0xa5   : > { %463 = vrot.lane.b32.xlu1 %v400_v31, %s1109_s26  ;;  %461 = vrot.lane.b32.xlu0 %v396_v32, %s1109_s26 }
  0xff   : > { %v345_v36 = vpop.permute.xlu1 %344  ;;  %v343_v37 = vpop.permute.xlu0 %342 }
 0x100   : > { %361 = vst.msk [vmem:[#allocation2 + $0x10] sm:$0xff] %vm332_vm0, %v345_v36  ;;  %v1196_v38 = vsel %vm332_vm0, %v343_v37, %v345_v36 }
 0x101   : > { %359 = vst.msk [vmem:[#allocation2] sm:$0xff] %vm358_vm2, %v343_v37  ;;  %v387_v42 = vmul.f32 %v383_v34, %v1196_v38 }
 0x103   : > { %v349_v39 = vpop.permute.xlu1 %348  ;;  %v347_v40 = vpop.permute.xlu0 %346 }
 0x104   : > { %364 = vst.msk [vmem:[#allocation2 + $0x28] sm:$0xff] %vm332_vm0, %v349_v39  ;;  %v1200_v41 = vsel %vm332_vm0, %v347_v40, %v349_v39  ;;  %vm783_vm0 = vcmask 7168  }
 0x105   : > { %362 = vst.msk [vmem:[#allocation2 + $0x18] sm:$0xff] %vm358_vm2, %v347_v40  ;;  %v389_v43 = vmul.f32 %v383_v34, %v1200_v41 }
 0x107   : > { %v894_v44 = vpack.c.bf16 %v389_v43, %v387_v42  ;;  %v402_v46 = vpop.permute.xlu0 %401  ;;  %v1214_v50 = vld [vmem:[#allocation2 + $0x10] sm:$0xff]  ;;  %v404_v53 = vpop.permute.xlu1 %403 }
 0x108   : > { %v1206_v47 = vld [vmem:[#allocation2] sm:$0xff]  ;;  %v1226_v57 = vpack.i.bf16 %v1214_v50, %v1196_v38  ;;  %v406_v59 = vsel %vm405_vm3, %v402_v46, %v404_v53  ;;  %v412_v1 = vmul.f32 %v404_v53, %v1214_v50 }
 0x109   : > { %895 = vmatprep.subr.bf16.mxu0 %v894_v44  ;;  %930 = vmatprep.subr.bf16.mxu1 %v894_v44  ;;  %v386_v51 = vmul.f32 %v379_v35, %v1206_v47  ;;  %v410_v62 = vmul.f32 %v402_v46, %v1206_v47  ;;  %v411_v2 = vmul.f32 %v406_v59, %v1196_v38 }
 0x10a   : > { %v414_v15 = vmul.f32 %v406_v59, %v1200_v41 }
 0x10b   : > { %v1212_v49 = vld [vmem:[#allocation2 + $0x28] sm:$0xff]  ;;  %v417_v54 = vpop.permute.xlu0 %416  ;;  %v419_v63 = vpop.permute.xlu1 %418  ;;  %v1019_v11 = vpack.i.bf16 %v412_v1, %v411_v2 }
 0x10c   : > { %v1204_v45 = vld [vmem:[#allocation2 + $0x18] sm:$0xff]  ;;  %v1222_v55 = vpack.i.bf16 %v1212_v49, %v1200_v41  ;;  %v425_v60 = vmul.f32 %v417_v54, %v1206_v47  ;;  %v421_v4 = vsel %vm420_vm4, %v417_v54, %v419_v63  ;;  %v430_v8 = vmul.f32 %v419_v63, %v1212_v49 }
 0x10d   : > { %v1210_v48 = vpack.i.bf16 %v1204_v45, %v1206_v47  ;;  %v388_v52 = vmul.f32 %v379_v35, %v1204_v45  ;;  %v413_v58 = vmul.f32 %v402_v46, %v1204_v45  ;;  %v428_v61 = vmul.f32 %v417_v54, %v1204_v45  ;;  %v368_v54 = vld [vmem:[%s1342_s5 + $0x8] sm:$0xff] }
 0x10e   : > { %v429_v9 = vmul.f32 %v421_v4, %v1200_v41  ;;  %v415_v12 = vmul.f32 %v404_v53, %v1212_v49  ;;  %v427_v19 = vmul.f32 %v419_v63, %v1214_v50  ;;  %v426_v20 = vmul.f32 %v421_v4, %v1196_v38  ;;  %887 = vmatprep.mubr.msk.f32.mxu0 %vm420_vm4, %v368_v54 }
 0x10f   : > { %980 = vrot.lane.b32.xlu1 %v1210_v48, %s1110_s27  ;;  %975 = vrot.lane.b32.xlu0 %v1210_v48, %s1111_s28  ;;  %v896_v56 = vpack.c.bf16 %v388_v52, %v386_v51  ;;  %v432_v0 = vpop.permute.xlu0 %431  ;;  %v1004_v3 = vpack.i.bf16 %v413_v58, %v410_v62  ;;  %v1009_v7 = vpack.i.bf16 %v428_v61, %v425_v60  ;;  %v434_v10 = vpop.permute.xlu1 %433 }
 0x110   : > { %v440_v5 = vmul.f32 %v432_v0, %v1206_v47  ;;  %v443_v6 = vmul.f32 %v432_v0, %v1204_v45  ;;  %v1034_v18 = vpack.i.bf16 %v430_v8, %v429_v9  ;;  %v436_v21 = vsel %vm435_vm5, %v432_v0, %v434_v10 }
 0x111   : > { %897 = vmatpush1.bf16.msra.mxu0 %v896_v56  ;;  %939 = vmatpush1.bf16.msra.mxu1 %v896_v56  ;;  %v1024_v22 = vpack.i.bf16 %v415_v12, %v414_v15  ;;  %v445_v24 = vmul.f32 %v434_v10, %v1212_v49  ;;  %v444_v25 = vmul.f32 %v436_v21, %v1200_v41 }
 0x112   : > { %v1014_v14 = vpack.i.bf16 %v443_v6, %v440_v5  ;;  %v1029_v28 = vpack.i.bf16 %v427_v19, %v426_v20  ;;  %v442_v32 = vmul.f32 %v434_v10, %v1214_v50  ;;  %v441_v33 = vmul.f32 %v436_v21, %v1196_v38 }
 0x113   : > { %990 = vrot.lane.b32.xlu1 %v1222_v55, %s1111_s28  ;;  %985 = vrot.lane.b32.xlu0 %v1226_v57, %s1111_s28  ;;  %v447_v13 = vpop.permute.xlu0 %446  ;;  %v449_v23 = vpop.permute.xlu1 %448  ;;  %v1054_v31 = vpack.i.bf16 %v445_v24, %v444_v25  ;;  %s291_s28 = scalar_lea.vmem %s1344_s7, %s893_s11 }
 0x114   : > { %v455_v16 = vmul.f32 %v447_v13, %v1206_v47  ;;  %v458_v17 = vmul.f32 %v447_v13, %v1204_v45  ;;  %v451_v27 = vsel %vm450_vm6, %v447_v13, %v449_v23  ;;  %v457_v29 = vmul.f32 %v449_v23, %v1214_v50 }
 0x115   : > { %v456_v30 = vmul.f32 %v451_v27, %v1196_v38  ;;  %v460_v37 = vmul.f32 %v449_v23, %v1212_v49  ;;  %v459_v39 = vmul.f32 %v451_v27, %v1200_v41  ;;  %v1049_v42 = vpack.i.bf16 %v442_v32, %v441_v33 }
 0x116   : > { %v1039_v26 = vpack.i.bf16 %v458_v17, %v455_v16 }
 0x117   : > { %995 = vrot.lane.b32.xlu1 %v1226_v57, %s1110_s27  ;;  %1000 = vrot.lane.b32.xlu0 %v1222_v55, %s1110_s27  ;;  %v464_v34 = vpop.permute.xlu1 %463  ;;  %v462_v35 = vpop.permute.xlu0 %461  ;;  %v1059_v36 = vpack.i.bf16 %v457_v29, %v456_v30  ;;  %v1069_v46 = vpack.i.bf16 %v460_v37, %v459_v39 }
 0x118   : > { %v466_v40 = vsel %vm465_vm7, %v462_v35, %v464_v34  ;;  %v472_v43 = vmul.f32 %v464_v34, %v1214_v50  ;;  %v470_v51 = vmul.f32 %v462_v35, %v1206_v47  ;;  %v473_v52 = vmul.f32 %v462_v35, %v1204_v45 }
 0x119   : > { %v471_v44 = vmul.f32 %v466_v40, %v1196_v38  ;;  %v475_v56 = vmul.f32 %v464_v34, %v1212_v49  ;;  %v370_v38 = vld [vmem:[%s1342_s5 + $0x18] sm:$0xff] }
 0x11a   : > { %v1089_v45 = vpack.i.bf16 %v473_v52, %v470_v51  ;;  %888 = vmatprep.mubr.msk.f32.mxu1 %vm420_vm4, %v370_v38 }
 0x11b   : > { %1005 = vrot.lane.b32.xlu1 %v1004_v3, %s1112_s29  ;;  %1010 = vrot.lane.b32.xlu0 %v1009_v7, %s1113_s30  ;;  %v1079_v53 = vpack.i.bf16 %v472_v43, %v471_v44 }
 0x11f   : > { %1020 = vrot.lane.b32.xlu1 %v1019_v11, %s1112_s29  ;;  %1015 = vrot.lane.b32.xlu0 %v1014_v14, %s1114_s8 }
 0x123   : > { %1035 = vrot.lane.b32.xlu1 %v1034_v18, %s1113_s30  ;;  %1025 = vrot.lane.b32.xlu0 %v1024_v22, %s1112_s29 }
 0x127   : > { %1040 = vrot.lane.b32.xlu1 %v1039_v26, %s1115_s9  ;;  %1030 = vrot.lane.b32.xlu0 %v1029_v28, %s1113_s30 }
 0x12b   : > { %1055 = vrot.lane.b32.xlu1 %v1054_v31, %s1114_s8  ;;  %1045 = vrot.lane.b32.xlu0 %v1226_v57, %s1116_s10  ;;  %v474_v57 = vmul.f32 %v466_v40, %v1200_v41 }
 0x12d   : > { %v1084_v47 = vpack.i.bf16 %v475_v56, %v474_v57 }
 0x12f   : > { %1060 = vrot.lane.b32.xlu1 %v1059_v36, %s1115_s9  ;;  %1050 = vrot.lane.b32.xlu0 %v1049_v42, %s1114_s8 }
 0x133   : > { %1065 = vrot.lane.b32.xlu1 %v1222_v55, %s1116_s10  ;;  %1070 = vrot.lane.b32.xlu0 %v1069_v46, %s1115_s9 }
 0x137   : > { %1080 = vrot.lane.b32.xlu1 %v1079_v53, %s1117_s14  ;;  %1075 = vrot.lane.b32.xlu0 %v1210_v48, %s1116_s10 }
 0x13b   : > { %1090 = vrot.lane.b32.xlu1 %v1089_v45, %s1117_s14  ;;  %1085 = vrot.lane.b32.xlu0 %v1084_v47, %s1117_s14 }
 0x181   : > { %v1281_v50 = vpop.permute.xlu1 %980  ;;  %v976_v49 = vpop.permute.xlu0 %975 }
 0x182   : > { %v978_v55 = vunpack.i.h.bf16 %v976_v49  ;;  %v977_v48 = vunpack.i.l.bf16 %v976_v49  ;;  %v983_v37 = vunpack.i.h.bf16 %v1281_v50  ;;  %v982_v43 = vunpack.i.l.bf16 %v1281_v50 }
 0x185   : > { %v991_v41 = vpop.permute.xlu1 %990  ;;  %v986_v60 = vpop.permute.xlu0 %985 }
 0x186   : > { %v993_v58 = vunpack.i.h.bf16 %v991_v41  ;;  %v992_v59 = vunpack.i.l.bf16 %v991_v41  ;;  %v988_v61 = vunpack.i.h.bf16 %v986_v60  ;;  %v987_v62 = vunpack.i.l.bf16 %v986_v60 }
 0x188   : > { %v498_v63 = vsel %vm494_vm8, %v992_v59, %v993_v58  ;;  %v497_v0 = vsel %vm494_vm8, %v978_v55, %v992_v59  ;;  %v496_v2 = vsel %vm494_vm8, %v987_v62, %v988_v61  ;;  %v495_v3 = vsel %vm494_vm8, %v977_v48, %v987_v62 }
 0x189   : > { %v996_v1 = vpop.permute.xlu1 %995  ;;  %v1001_v4 = vpop.permute.xlu0 %1000  ;;  %v898_v5 = vpack.c.bf16 %v498_v63, %v496_v2  ;;  %v900_v6 = vpack.c.bf16 %v497_v0, %v495_v3 }
 0x18a   : > { %v998_v14 = vunpack.i.h.bf16 %v996_v1  ;;  %v997_v15 = vunpack.i.l.bf16 %v996_v1  ;;  %v1003_v21 = vunpack.i.h.bf16 %v1001_v4  ;;  %v1002_v22 = vunpack.i.l.bf16 %v1001_v4 }
 0x18b   : > { %899 = vmatprep.subr.bf16.mxu0 %v898_v5  ;;  %931 = vmatprep.subr.bf16.mxu1 %v898_v5 }
 0x18c   : > { %901 = vmatpush1.bf16.msra.mxu0 %v900_v6  ;;  %940 = vmatpush1.bf16.msra.mxu1 %v900_v6  ;;  %v571_v40 = vsel %vm569_vm9, %v997_v15, %v998_v14  ;;  %v573_v42 = vsel %vm569_vm9, %v1002_v22, %v1003_v21  ;;  %v570_v57 = vsel %vm569_vm9, %v982_v43, %v997_v15 }
 0x18d   : > { %v1006_v7 = vpop.permute.xlu1 %1005  ;;  %v1011_v8 = vpop.permute.xlu0 %1010  ;;  %v572_v38 = vsel %vm569_vm9, %v983_v37, %v1002_v22  ;;  %v910_v50 = vpack.c.bf16 %v573_v42, %v571_v40 }
 0x18e   : > { %v1008_v17 = vunpack.i.h.bf16 %v1006_v7  ;;  %v1007_v18 = vunpack.i.l.bf16 %v1006_v7  ;;  %v1013_v33 = vunpack.i.h.bf16 %v1011_v8  ;;  %v1012_v34 = vunpack.i.l.bf16 %v1011_v8 }
 0x18f   : > { %v912_v55 = vpack.c.bf16 %v572_v38, %v570_v57 }
 0x191   : > { %v1021_v9 = vpop.permute.xlu1 %1020  ;;  %v1283_v10 = vpop.permute.xlu0 %1015 }
 0x192   : > { %v1023_v11 = vunpack.i.h.bf16 %v1021_v9  ;;  %v1022_v12 = vunpack.i.l.bf16 %v1021_v9  ;;  %v1018_v58 = vunpack.i.h.bf16 %v1283_v10  ;;  %v1017_v59 = vunpack.i.l.bf16 %v1283_v10 }
 0x194   : > { %v523_v26 = vsel %vm521_vm10, %v1022_v12, %v1023_v11  ;;  %v522_v28 = vsel %vm521_vm10, %v1007_v18, %v1022_v12 }
 0x195   : > { %v1036_v13 = vpop.permute.xlu1 %1035  ;;  %v1026_v16 = vpop.permute.xlu0 %1025 }
 0x196   : > { %v1028_v19 = vunpack.i.h.bf16 %v1026_v16  ;;  %v1027_v20 = vunpack.i.l.bf16 %v1026_v16  ;;  %v1038_v23 = vunpack.i.h.bf16 %v1036_v13  ;;  %v1037_v24 = vunpack.i.l.bf16 %v1036_v13 }
 0x198   : > { %v525_v27 = vsel %vm521_vm10, %v1027_v20, %v1028_v19  ;;  %v524_v29 = vsel %vm521_vm10, %v1008_v17, %v1027_v20  ;;  %v552_v39 = vsel %vm548_vm11, %v1037_v24, %v1038_v23  ;;  %v551_v52 = vsel %vm548_vm11, %v1013_v33, %v1037_v24 }
 0x199   : > { %v1285_v25 = vpop.permute.xlu1 %1040  ;;  %v1031_v30 = vpop.permute.xlu0 %1030  ;;  %v902_v31 = vpack.c.bf16 %v525_v27, %v523_v26  ;;  %v904_v32 = vpack.c.bf16 %v524_v29, %v522_v28 }
 0x19a   : > { %v1033_v35 = vunpack.i.h.bf16 %v1031_v30  ;;  %v1032_v36 = vunpack.i.l.bf16 %v1031_v30  ;;  %v1043_v61 = vunpack.i.h.bf16 %v1285_v25  ;;  %v1042_v1 = vunpack.i.l.bf16 %v1285_v25 }
 0x19b   : > { %903 = vmatprep.subr.bf16.mxu0 %v902_v31  ;;  %932 = vmatprep.subr.bf16.mxu1 %v902_v31 }
 0x19c   : > { %905 = vmatpush1.bf16.msra.mxu0 %v904_v32  ;;  %941 = vmatpush1.bf16.msra.mxu1 %v904_v32  ;;  %v550_v46 = vsel %vm548_vm11, %v1032_v36, %v1033_v35  ;;  %v549_v51 = vsel %vm548_vm11, %v1012_v34, %v1032_v36 }
 0x19d   : > { %v1056_v44 = vpop.permute.xlu1 %1055  ;;  %v1295_v53 = vpop.permute.xlu0 %1045  ;;  %v906_v54 = vpack.c.bf16 %v552_v39, %v550_v46  ;;  %v908_v56 = vpack.c.bf16 %v551_v52, %v549_v51  ;;  %v367_v52 = vld [vmem:[%s1342_s5] sm:$0xff] }
 0x19e   : > { %v1058_v45 = vunpack.i.h.bf16 %v1056_v44  ;;  %v1057_v47 = vunpack.i.l.bf16 %v1056_v44  ;;  %v1048_v11 = vunpack.i.h.bf16 %v1295_v53  ;;  %v1047_v12 = vunpack.i.l.bf16 %v1295_v53  ;;  %v369_v53 = vld [vmem:[%s1342_s5 + $0x10] sm:$0xff] }
 0x19f   : > { %907 = vmatprep.subr.bf16.mxu0 %v906_v54  ;;  %933 = vmatprep.subr.bf16.mxu1 %v906_v54 }
 0x1a0   : > { %909 = vmatpush1.bf16.msra.mxu0 %v908_v56  ;;  %942 = vmatpush1.bf16.msra.mxu1 %v908_v56  ;;  %v600_v0 = vsel %vm596_vm12, %v1057_v47, %v1058_v45  ;;  %v599_v5 = vsel %vm596_vm12, %v1018_v58, %v1057_v47  ;;  %v646_v26 = vsel %vm644_vm14, %v1047_v12, %v1048_v11 }
 0x1a1   : > { %v1061_v49 = vpop.permute.xlu1 %1060  ;;  %v1051_v41 = vpop.permute.xlu0 %1050  ;;  %911 = vmatprep.subr.bf16.mxu0 %v910_v50  ;;  %934 = vmatprep.subr.bf16.mxu1 %v910_v50 }
 0x1a2   : > { %v1053_v60 = vunpack.i.h.bf16 %v1051_v41  ;;  %v1052_v48 = vunpack.i.l.bf16 %v1051_v41  ;;  %v1063_v62 = vunpack.i.h.bf16 %v1061_v49  ;;  %v1062_v63 = vunpack.i.l.bf16 %v1061_v49 }
 0x1a4   : > { %913 = vmatpush1.bf16.msra.mxu0 %v912_v55  ;;  %943 = vmatpush1.bf16.msra.mxu1 %v912_v55  ;;  %v598_v3 = vsel %vm596_vm12, %v1052_v48, %v1053_v60  ;;  %v597_v4 = vsel %vm596_vm12, %v1017_v59, %v1052_v48  ;;  %v625_v15 = vsel %vm623_vm13, %v1062_v63, %v1063_v62 }
 0x1a5   : > { %v1066_v2 = vpop.permute.xlu1 %1065  ;;  %v1071_v8 = vpop.permute.xlu0 %1070  ;;  %v914_v9 = vpack.c.bf16 %v600_v0, %v598_v3  ;;  %v916_v10 = vpack.c.bf16 %v599_v5, %v597_v4  ;;  %v624_v16 = vsel %vm623_vm13, %v1042_v1, %v1062_v63 }
 0x1a6   : > { %v1068_v6 = vunpack.i.h.bf16 %v1066_v2  ;;  %v1067_v7 = vunpack.i.l.bf16 %v1066_v2  ;;  %v1073_v13 = vunpack.i.h.bf16 %v1071_v8  ;;  %v1072_v14 = vunpack.i.l.bf16 %v1071_v8 }
 0x1a7   : > { %915 = vmatprep.subr.bf16.mxu0 %v914_v9  ;;  %935 = vmatprep.subr.bf16.mxu1 %v914_v9 }
 0x1a8   : > { %917 = vmatpush1.bf16.msra.mxu0 %v916_v10  ;;  %944 = vmatpush1.bf16.msra.mxu1 %v916_v10  ;;  %v627_v18 = vsel %vm623_vm13, %v1072_v14, %v1073_v13  ;;  %v626_v19 = vsel %vm623_vm13, %v1043_v61, %v1072_v14  ;;  %v648_v20 = vsel %vm644_vm14, %v1067_v7, %v1068_v6 }
 0x1a9   : > { %v1081_v17 = vpop.permute.xlu1 %1080  ;;  %v1076_v21 = vpop.permute.xlu0 %1075  ;;  %v918_v22 = vpack.c.bf16 %v627_v18, %v625_v15  ;;  %v920_v23 = vpack.c.bf16 %v626_v19, %v624_v16  ;;  %v922_v27 = vpack.c.bf16 %v648_v20, %v646_v26 }
 0x1aa   : > { %v1078_v24 = vunpack.i.h.bf16 %v1076_v21  ;;  %v1077_v25 = vunpack.i.l.bf16 %v1076_v21  ;;  %v1083_v28 = vunpack.i.h.bf16 %v1081_v17  ;;  %v1082_v29 = vunpack.i.l.bf16 %v1081_v17 }
 0x1ab   : > { %919 = vmatprep.subr.bf16.mxu0 %v918_v22  ;;  %936 = vmatprep.subr.bf16.mxu1 %v918_v22 }
 0x1ac   : > { %921 = vmatpush1.bf16.msra.mxu0 %v920_v23  ;;  %945 = vmatpush1.bf16.msra.mxu1 %v920_v23  ;;  %v645_v31 = vsel %vm644_vm14, %v1077_v25, %v1047_v12  ;;  %v647_v32 = vsel %vm644_vm14, %v1078_v24, %v1067_v7  ;;  %v673_v42 = vsel %vm671_vm15, %v1082_v29, %v1083_v28 }
 0x1ad   : > { %v1091_v30 = vpop.permute.xlu1 %1090  ;;  %v1086_v35 = vpop.permute.xlu0 %1085  ;;  %923 = vmatprep.subr.bf16.mxu0 %v922_v27  ;;  %937 = vmatprep.subr.bf16.mxu1 %v922_v27  ;;  %v924_v36 = vpack.c.bf16 %v647_v32, %v645_v31 }
 0x1ae   : > { %v1093_v33 = vunpack.i.h.bf16 %v1091_v30  ;;  %v1092_v34 = vunpack.i.l.bf16 %v1091_v30  ;;  %v1088_v37 = vunpack.i.h.bf16 %v1086_v35  ;;  %v1087_v39 = vunpack.i.l.bf16 %v1086_v35 }
 0x1b0   : > { %v672_v40 = vsel %vm671_vm15, %v1092_v34, %v1082_v29  ;;  %925 = vmatpush1.bf16.msra.mxu0 %v924_v36  ;;  %946 = vmatpush1.bf16.msra.mxu1 %v924_v36  ;;  %v675_v43 = vsel %vm671_vm15, %v1087_v39, %v1088_v37  ;;  %v674_v44 = vsel %vm671_vm15, %v1093_v33, %v1087_v39 }
 0x1b1   : > { %v926_v46 = vpack.c.bf16 %v675_v43, %v673_v42  ;;  %v928_v51 = vpack.c.bf16 %v674_v44, %v672_v40 }
 0x1b3   : > { %927 = vmatprep.subr.bf16.mxu0 %v926_v46  ;;  %938 = vmatprep.subr.bf16.mxu1 %v926_v46 }
 0x1b4   : > { %929 = vmatpush1.bf16.msra.mxu0 %v928_v51  ;;  %947 = vmatpush1.bf16.msra.mxu1 %v928_v51 }
 0x1b7   : > { %751 = vmatmul.mubr.f32.vlgmr.msra.gmra.mrb[0].mxu0 %v367_v52  ;;  %757 = vmatmul.mubr.f32.vlgmr.msra.gmra.mrb[0].mxu1 %v369_v53 }
 0x28a   : > { %v752_v54 = vpop.f32.mrb[0].mxu0  ;;  %v758_v56 = vpop.f32.mrb[0].mxu1 }
 0x28b   : > { %763 = vst [vmem:[%s286_s23] sm:$0xff] %v752_v54  ;;  %v754_v57 = vpop.f32.mrb[1].mxu0  ;;  %765 = vst [vmem:[%s286_s23 + $0x10] sm:$0xff] %v758_v56  ;;  %v760_v38 = vpop.f32.mrb[1].mxu1  ;;  %v773_v45 = vmul.f32 %v752_v54, %v752_v54  ;;  %v775_v47 = vmul.f32 %v758_v56, %v758_v56 }
 0x28c   : > { %764 = vst [vmem:[%s286_s23 + $0x8] sm:$0xff] %v754_v57  ;;  %v774_v50 = vmul.f32 %v754_v57, %v754_v57  ;;  %v767_v49 = vadd.f32 %v754_v57, %v752_v54  ;;  %766 = vst [vmem:[%s286_s23 + $0x18] sm:$0xff] %v760_v38  ;;  %v776_v41 = vmul.f32 %v760_v38, %v760_v38 }
 0x28d   : > { %v770_v55 = vadd.f32 %v760_v38, %v758_v56 }
 0x28e   : > { %768 = vadd.xlane.f32.xlu0 %v767_v49  ;;  %v777_v58 = vadd.f32 %v774_v50, %v773_v45  ;;  %v780_v59 = vadd.f32 %v776_v41, %v775_v47 }
 0x28f   : > { %771 = vadd.xlane.f32.xlu1 %v770_v55 }
 0x292   : > { %778 = vadd.xlane.f32.xlu0 %v777_v58 }
 0x296   : > { %781 = vadd.xlane.f32.xlu0 %v780_v59 }
 0x31b   : > { %v769_v60 = vpop.xlane.xlu0 %768 }
 0x31c   : > { %v772_v62 = vpop.xlane.xlu1 %771 }
 0x31f   : > { %v779_v48 = vpop.xlane.xlu0 %778 }
 0x320   : > { %v784_v61 = vsel %vm783_vm0, %v769_v60, %v779_v48 }
 0x321   : > { %786 = vst.msk [vmem:[%s291_s28] sm:$0xff] %vm405_vm3, %v784_v61 }
 0x323   : > { %v782_v63 = vpop.xlane.xlu0 %781 }
 0x324   : > { %v785_v0 = vsel %vm783_vm0, %v772_v62, %v782_v63 }
 0x325   : > { %787 = vst.msk [vmem:[%s291_s28 + $0x8] sm:$0xff] %vm405_vm3, %v785_v0 }
 0x326 PF: > { %s18_s24 = sadd.s32 1, %s1100_s24  }
 0x327   : > { %p15_p4 = scmp.ge.s32.totalorder %s18_s24, 4  }
 0x329   :  { %17 = sbr.rel (!%p15_p4) target bundleno = 1 (0x1), region = 86 }

// kernel: decoder_block_forward.7
= control target key start
LH: loop header
LB: loop body
LE: loop exit
PB: predicated region body
PF: predicated region fallthrough
CT: control target
= control target key end

     0   :  { %s323_s12 = smov 0   ;;  %s352_s0 = inlined_call_operand.vmem [shape: f32[2,16,256], index: 0, kind: input, shape index: {}]   ;;  %s353_s1 = inlined_call_operand.vmem [shape: f32[16,1], index: 1, kind: input, shape index: {}]   ;;  %s354_s2 = inlined_call_operand.vmem [shape: f32[16,1], index: 2, kind: input, shape index: {}]   ;;  %s355_s3 = inlined_call_operand.vmem [shape: f32[2,16,256], index: 3, kind: output, shape index: {}]  }
   0x1 LB: > { %s270_s13 = sadd.s32 4294967295, %s300_s12   ;;  %p274_p0 = scmp.ge.s32.totalorder %s300_s12, 1  ;;  %s300_s12 = sphi %s323_s12, %s13_s12  }
   0x2   : > { %p137_p1 = scmp.lt.s32.totalorder %s300_s12, 3 }
   0x4   : > { %p138_p2 = pnand %p274_p0, %p137_p1 }
   0x5   : > { %v191_v0 = vld [vmem:[%s354_s2] sm:$0xff] (!%p138_p2)  ;;  %v302_v2 = vmov (!%p138_p2), 0   ;;  %v192_v3 = vld [vmem:[%s354_s2 + $0x8] sm:$0xff] (!%p138_p2)  ;;  %p161_p3 = scmp.lt.s32.totalorder (!%p138_p2), %s270_s13, 1 }
   0x6   : > { %141 = sbr.rel (%p138_p2) target bundleno = 146 (0x92), region = 32  ;;  %v175_v1 = vld [vmem:[%s353_s1] sm:$0xff] (!%p138_p2)  ;;  %293 = vset.pattern.permute.xlu1 (!%p138_p2), %v302_v2  ;;  %292 = vset.pattern.permute.xlu0 (!%p138_p2), %v302_v2  ;;  %v176_v4 = vld [vmem:[%s353_s1 + $0x8] sm:$0xff] (!%p138_p2) }
   0x7   : > { %195 = vperm.xlu1 (!%p138_p2), %293, %v191_v0   ;;  %179 = vperm.xlu0 (!%p138_p2), %292, %v175_v1  }
   0xb   : > { %200 = vperm.xlu1 (!%p138_p2), %293, %v192_v3   ;;  %184 = vperm.xlu0 (!%p138_p2), %292, %v176_v4  }
   0xd   : > { %s357_s13 = smov (!%p161_p3, %s270_s13), 1 }
   0xe   : > { %s281_s22 = sshll.u32 %s357_s13, 5 }
   0xf   : > { %s165_s25 = scalar_lea.vmem %s352_s0, %s281_s22  ;;  %s170_s28 = scalar_lea.vmem %s355_s3, %s281_s22 }
  0x10   : > { %v171_v5 = vld [vmem:[%s165_s25] sm:$0xff]  ;;  %v172_v6 = vld [vmem:[%s165_s25 + $0x8] sm:$0xff]  ;;  %v173_v11 = vld [vmem:[%s165_s25 + $0x10] sm:$0xff] }
  0x11   : > { %v174_v12 = vld [vmem:[%s165_s25 + $0x18] sm:$0xff] }
  0x86   : > { %v196_v7 = vpop.permute.xlu1 %195  ;;  %v180_v8 = vpop.permute.xlu0 %179 }
  0x87   : > { %v187_v9 = vmul.f32 %v180_v8, %v171_v5  ;;  %v188_v10 = vmul.f32 %v180_v8, %v172_v6 }
  0x89   : > { %v203_v13 = vadd.f32 %v196_v7, %v187_v9  ;;  %v204_v14 = vadd.f32 %v196_v7, %v188_v10 }
  0x8a   : > { %v185_v15 = vpop.permute.xlu0 %184  ;;  %v201_v20 = vpop.permute.xlu1 %200 }
  0x8b   : > { %v207_v16 = vmax.f32 %v203_v13, 0.0  ;;  %v208_v17 = vmax.f32 %v204_v14, 0.0  ;;  %v189_v18 = vmul.f32 %v185_v15, %v173_v11  ;;  %v190_v19 = vmul.f32 %v185_v15, %v174_v12 }
  0x8d   : > { %211 = vst [vmem:[%s170_s28] sm:$0xff] %v207_v16  ;;  %212 = vst [vmem:[%s170_s28 + $0x8] sm:$0xff] %v208_v17  ;;  %v205_v21 = vadd.f32 %v201_v20, %v189_v18  ;;  %v206_v22 = vadd.f32 %v201_v20, %v190_v19 }
  0x8f   : > { %v209_v23 = vmax.f32 %v205_v21, 0.0  ;;  %v210_v24 = vmax.f32 %v206_v22, 0.0 }
  0x91   : > { %213 = vst [vmem:[%s170_s28 + $0x10] sm:$0xff] %v209_v23  ;;  %214 = vst [vmem:[%s170_s28 + $0x18] sm:$0xff] %v210_v24 }
  0x92 PF: > { %s13_s12 = sadd.s32 1, %s300_s12  }
  0x93   : > { %p10_p4 = scmp.ge.s32.totalorder %s13_s12, 4  }
  0x95   :  { %12 = sbr.rel (!%p10_p4) target bundleno = 1 (0x1), region = 62 }

</bundles_post_ra>
